<compile_context>
chip_gen: v6e
topology: v6e:2x2x1
jax: 0.10.0
libtpu: 0.0.40
codegen_flags: <defaults>
</compile_context>

<pallas_src>
import math
import functools

import jax
import jax.numpy as jnp
import numpy as np
from jax import lax
from jax.experimental import pallas as pl
from jax.experimental.pallas import tpu as pltpu


# ---------------------------------------------------------------------------
# Pallas kernel: one batch super-block (batch_block elements) per grid step.
# ---------------------------------------------------------------------------
def task_aware_attention_kernel(
    hs_ref,      # (BB, S, H)  hidden states
    te_ref,      # (BB, 1, T)  task embedding
    bias_ref,    # (BB, 1, S)  additive attention-mask bias (0 keep / -1e9 drop)
    wt_ref,      # (T, H)      task projection weight
    wqkv_ref,    # (H, 3H)     fused [wq | wk | wv]
    wo_ref,      # (H, H)      output projection weight
    misc_ref,    # (7, H): rows = [bq, bk, bv, bt, bo, gamma, beta]
    out_ref,     # (BB, S, H)
    *,
    num_heads: int,
    head_dim: int,
    batch_block: int,
    seq_len: int,
):
    BB, S = batch_block, seq_len
    H = num_heads * head_dim
    M = BB * S

    misc = misc_ref[...]                              # (7, H)
    bq, bk, bv = misc[0:1, :], misc[1:2, :], misc[2:3, :]
    bt, bo = misc[3:4, :], misc[4:5, :]
    gamma, beta = misc[5:6, :], misc[6:7, :]

    hs = hs_ref[...]                                  # (BB, S, H)
    hs_flat = hs.reshape(M, H)

    # task_info = Linear(task_dim -> hidden)(task_embedding)
    te = te_ref[...].reshape(BB, -1)                  # (BB, T)
    task_info = jnp.dot(te, wt_ref[...],
                        preferred_element_type=jnp.float32) + bt      # (BB, H)
    xq_flat = (hs + task_info[:, None, :]).reshape(M, H)              # (M, H)

    # Lane-dense projections: Q separately (different LHS), K/V fused.
    wqkv = wqkv_ref[...]                              # (H, 3H)
    q = jnp.dot(xq_flat, wqkv[:, :H],
                preferred_element_type=jnp.float32) + bq              # (M, H)
    kv = jnp.dot(hs_flat, wqkv[:, H:],
                 preferred_element_type=jnp.float32)                  # (M, 2H)
    k = kv[:, :H] + bk
    v = kv[:, H:] + bv

    q3 = q.reshape(BB, S, H)
    k3 = k.reshape(BB, S, H)
    v3 = v.reshape(BB, S, H)

    bias = bias_ref[...]                              # (BB, 1, S)
    scale = jnp.float32(1.0 / math.sqrt(head_dim))

    # Per-head scores, batched over the block's batch dim; collect all heads
    # so the softmax runs once on the whole slab.
    scores_list = []
    v_heads = []
    for h in range(num_heads):                        # static, small
        lo = h * head_dim
        hi = lo + head_dim
        qh = q3[:, :, lo:hi]                          # (BB, S, hd)
        kh = k3[:, :, lo:hi]
        v_heads.append(v3[:, :, lo:hi])
        s_h = lax.dot_general(                        # 'bqd,bkd->bqk'
            qh, kh, (((2,), (2,)), ((0,), (0,))),
            preferred_element_type=jnp.float32)       # (BB, S, S)
        scores_list.append(s_h * scale + bias)

    scores = (scores_list[0] if num_heads == 1
              else jnp.concatenate(scores_list, axis=0))   # (nh*BB, S, S)

    # Single softmax over all heads / batch elements.
    scores = scores - jnp.max(scores, axis=-1, keepdims=True)
    probs = jnp.exp(scores)
    denom = jnp.sum(probs, axis=-1, keepdims=True)
    probs = probs * pl.reciprocal(denom, approx=False)

    # Per-head PV, batched over the batch dim; concat heads on the lane axis.
    ctx_heads = []
    for h in range(num_heads):
        p_h = probs[h * BB:(h + 1) * BB]              # (BB, S, S)
        ctx_heads.append(
            lax.dot_general(                          # 'bqk,bkd->bqd'
                p_h, v_heads[h], (((2,), (1,)), ((0,), (0,))),
                preferred_element_type=jnp.float32))  # (BB, S, hd)
    ctx = (ctx_heads[0] if num_heads == 1
           else jnp.concatenate(ctx_heads, axis=-1)).reshape(M, H)

    # Single lane-dense output projection + bias + residual + LayerNorm.
    out = jnp.dot(ctx, wo_ref[...],
                  preferred_element_type=jnp.float32) + bo
    res = out + hs_flat
    mean = jnp.mean(res, axis=-1, keepdims=True)
    var = jnp.mean((res - mean) ** 2, axis=-1, keepdims=True)
    normed = (res - mean) * lax.rsqrt(var + 1e-5)
    y = normed * gamma + beta

    out_ref[...] = y.reshape(BB, S, H).astype(out_ref.dtype)


# ---------------------------------------------------------------------------
# Wrapper: fused weight packing, grid sizing, BlockSpecs.
# ---------------------------------------------------------------------------
def _default_batch_block(B, S):
    """grid=1 on single-TC chips; 2-way split only on 2-TC devices with
    enough per-core work to amortize per-step overhead."""
    n_tc = 1
    try:
        kind = jax.devices()[0].device_kind.lower()
        if "v7" in kind:
            n_tc = 2
    except Exception:
        pass
    if n_tc >= 2 and B % 2 == 0 and (B // 2) * S >= 256:
        return B // 2
    return B


def _vmem_limit_bytes(batch_block, S, H, T):
    """Raise the scoped-VMEM limit only when the working set outgrows the
    default; cap below v7x's 64 MiB physical VMEM."""
    f32 = 4
    blocks = (2 * 2 * batch_block * S * H          # hs + out, double-buffered
              + 2 * batch_block * (T + S)
              + T * H + 3 * H * H + H * H + 8 * H)
    interm = batch_block * S * (8 * H + 8 * S)     # q/k/v/ctx/res + score slabs
    est = (blocks + interm) * f32
    default = 16 * 1024 * 1024                     # v5e's (lowest) default
    if 2 * est <= default:
        return None
    return int(min(max(2 * est, default), 63 * 1024 * 1024))


def task_aware_attention(hidden_states, task_embedding, mask, params,
                         num_heads, batch_block=None):
    B, S, H = hidden_states.shape
    T = task_embedding.shape[-1]
    head_dim = H // num_heads
    assert head_dim * num_heads == H

    if batch_block is None:
        batch_block = _default_batch_block(B, S)
    assert B % batch_block == 0
    num_blocks = B // batch_block

    te3 = task_embedding.reshape(B, 1, T).astype(jnp.float32)
    # Additive mask bias (0 keep / -1e9 drop), computed once outside the kernel.
    mask_bias = jnp.where(mask.reshape(B, 1, S) == 0.0,
                          jnp.float32(-1e9), jnp.float32(0.0))

    # Fused projection weight and packed small params.
    wqkv = jnp.concatenate([params["wq"], params["wk"], params["wv"]], axis=1)
    misc = jnp.concatenate(
        [params["bq"], params["bk"], params["bv"],
         params["bt"], params["bo"], params["gamma"], params["beta"]], axis=0)

    kernel = functools.partial(task_aware_attention_kernel,
                               num_heads=num_heads, head_dim=head_dim,
                               batch_block=batch_block, seq_len=S)

    def blk3(shape):
        return pl.BlockSpec(shape, lambda i: (i, 0, 0))

    def rep2(shape):
        return pl.BlockSpec(shape, lambda i: (0, 0))

    in_specs = [
        blk3((batch_block, S, H)),     # hidden_states
        blk3((batch_block, 1, T)),     # task_embedding
        blk3((batch_block, 1, S)),     # mask bias
        rep2((T, H)),                  # task projection weight
        rep2((H, 3 * H)),              # fused [wq | wk | wv]
        rep2((H, H)),                  # output projection weight
        rep2((7, H)),                  # [bq, bk, bv, bt, bo, gamma, beta]
    ]

    return pl.pallas_call(
        kernel,
        out_shape=jax.ShapeDtypeStruct((B, S, H), jnp.float32),
        grid_spec=pltpu.PrefetchScalarGridSpec(
            num_scalar_prefetch=0,
            grid=(num_blocks,),
            in_specs=in_specs,
            out_specs=pl.BlockSpec((batch_block, S, H), lambda i: (i, 0, 0)),
        ),
        compiler_params=pltpu.CompilerParams(
            dimension_semantics=(
                ("parallel",) if num_blocks > 1 else ("arbitrary",)),
            vmem_limit_bytes=_vmem_limit_bytes(batch_block, S, H, T)),
    )(hidden_states.astype(jnp.float32), te3, mask_bias,
      params["wt"], wqkv, params["wo"], misc)


# ---------------------------------------------------------------------------
# Pure-JAX reference (mirrors the PyTorch forward, eval mode).
# ---------------------------------------------------------------------------
def reference(hidden_states, task_embedding, mask, params, num_heads):
    B, S, H = hidden_states.shape
    hd = H // num_heads

    task_info = task_embedding @ params["wt"] + params["bt"]        # (B, H)
    task_info = task_info[:, None, :]                               # (B, 1, H)

    q = (hidden_states + task_info) @ params["wq"] + params["bq"]
    k = hidden_states @ params["wk"] + params["bk"]
    v = hidden_states @ params["wv"] + params["bv"]

    def split(x):  # (B, S, H) -> (B, nh, S, hd)
        return x.reshape(B, S, num_heads, hd).transpose(0, 2, 1, 3)

    q, k, v = split(q), split(k), split(v)
    scores = jnp.einsum("bhqd,bhkd->bhqk", q, k) / math.sqrt(hd)
    m = mask[:, None, None, :]                                      # (B,1,1,S)
    scores = jnp.where(m == 0, -1e9, scores)
    attn = jax.nn.softmax(scores, axis=-1)
    ctx = jnp.einsum("bhqk,bhkd->bhqd", attn, v)
    ctx = ctx.transpose(0, 2, 1, 3).reshape(B, S, H)
    out = ctx @ params["wo"] + params["bo"]
    res = out + hidden_states
    mean = jnp.mean(res, axis=-1, keepdims=True)
    var = jnp.mean((res - mean) ** 2, axis=-1, keepdims=True)
    return (res - mean) / jnp.sqrt(var + 1e-5) * params["gamma"] + params["beta"]


# ---------------------------------------------------------------------------
if __name__ == "__main__":
    B, S, H, T = 2, 16, 128, 32
    NUM_HEADS = 4

    key = jax.random.PRNGKey(0)
    keys = jax.random.split(key, 16)

    def lin(kw, kb, fan_in, fan_out):
        bound = 1.0 / math.sqrt(fan_in)
        w = jax.random.uniform(kw, (fan_in, fan_out), jnp.float32, -bound, bound)
        b = jax.random.uniform(kb, (1, fan_out), jnp.float32, -bound, bound)
        return w, b

    wt, bt = lin(keys[0], keys[1], T, H)
    wq, bq = lin(keys[2], keys[3], H, H)
    wk, bk = lin(keys[4], keys[5], H, H)
    wv, bv = lin(keys[6], keys[7], H, H)
    wo, bo = lin(keys[8], keys[9], H, H)
    params = dict(
        wt=wt, bt=bt, wq=wq, bq=bq, wk=wk, bk=bk, wv=wv, bv=bv, wo=wo, bo=bo,
        gamma=jnp.ones((1, H), jnp.float32),   # PyTorch LayerNorm default init
        beta=jnp.zeros((1, H), jnp.float32),
    )

    hidden_states = jax.random.normal(keys[10], (B, S, H), jnp.float32)
    task_embedding = jax.random.normal(keys[11], (B, T), jnp.float32)
    # Mask out the last 3 keys of batch element 1 to exercise masking.
    mask = jnp.ones((B, S), jnp.float32).at[1, S - 3:].set(0.0)

    out = task_aware_attention(hidden_states, task_embedding, mask, params,
                               NUM_HEADS)
    out = jax.block_until_ready(out)

    ref = reference(hidden_states, task_embedding, mask, params, NUM_HEADS)
    np.testing.assert_allclose(np.asarray(out), np.asarray(ref),
                               rtol=1e-4, atol=1e-4)
    print("KERNEL_OK")
</pallas_src>

<mosaic_0001>
module attributes {stable_mosaic.version = 11 : i64} {
  func.func @task_aware_attention_kernel(%arg0: i32, %arg1: memref<2x16x128xf32, #tpu.memory_space<vmem>>, %arg2: memref<2x1x32xf32, #tpu.memory_space<vmem>>, %arg3: memref<2x1x16xf32, #tpu.memory_space<vmem>>, %arg4: memref<32x128xf32, #tpu.memory_space<vmem>>, %arg5: memref<128x384xf32, #tpu.memory_space<vmem>>, %arg6: memref<128x128xf32, #tpu.memory_space<vmem>>, %arg7: memref<7x128xf32, #tpu.memory_space<vmem>>, %arg8: memref<2x16x128xf32, #tpu.memory_space<vmem>>) attributes {dimension_semantics = [#tpu.dimension_semantics<arbitrary>], iteration_bounds = array<i64: 1>, scalar_prefetch = 0 : i64, scratch_operands = 0 : i64, tpu.core_type = #tpu.core_type<tc>, window_params = [{transform_indices = @transform_0, window_bounds = array<i64: 2, 16, 128>}, {transform_indices = @transform_1, window_bounds = array<i64: 2, 1, 32>}, {transform_indices = @transform_2, window_bounds = array<i64: 2, 1, 16>}, {pipeline_mode = #tpu.pipeline_mode<synchronous>, transform_indices = @transform_3, window_bounds = array<i64: 32, 128>}, {pipeline_mode = #tpu.pipeline_mode<synchronous>, transform_indices = @transform_4, window_bounds = array<i64: 128, 384>}, {pipeline_mode = #tpu.pipeline_mode<synchronous>, transform_indices = @transform_5, window_bounds = array<i64: 128, 128>}, {pipeline_mode = #tpu.pipeline_mode<synchronous>, transform_indices = @transform_6, window_bounds = array<i64: 7, 128>}, {transform_indices = @transform_7, window_bounds = array<i64: 2, 16, 128>}]} {
    %c0 = arith.constant 0 : index
    %c0_0 = arith.constant 0 : index
    %0 = vector.load %arg7[%c0, %c0_0] : memref<7x128xf32, #tpu.memory_space<vmem>>, vector<7x128xf32>
    %1 = vector.extract_strided_slice %0 {offsets = [0, 0], sizes = [1, 128], strides = [1, 1]} : vector<7x128xf32> to vector<1x128xf32>
    %2 = vector.extract_strided_slice %0 {offsets = [1, 0], sizes = [1, 128], strides = [1, 1]} : vector<7x128xf32> to vector<1x128xf32>
    %3 = vector.extract_strided_slice %0 {offsets = [2, 0], sizes = [1, 128], strides = [1, 1]} : vector<7x128xf32> to vector<1x128xf32>
    %4 = vector.extract_strided_slice %0 {offsets = [3, 0], sizes = [1, 128], strides = [1, 1]} : vector<7x128xf32> to vector<1x128xf32>
    %5 = vector.extract_strided_slice %0 {offsets = [4, 0], sizes = [1, 128], strides = [1, 1]} : vector<7x128xf32> to vector<1x128xf32>
    %6 = vector.extract_strided_slice %0 {offsets = [5, 0], sizes = [1, 128], strides = [1, 1]} : vector<7x128xf32> to vector<1x128xf32>
    %7 = vector.extract_strided_slice %0 {offsets = [6, 0], sizes = [1, 128], strides = [1, 1]} : vector<7x128xf32> to vector<1x128xf32>
    %c0_1 = arith.constant 0 : index
    %c0_2 = arith.constant 0 : index
    %c0_3 = arith.constant 0 : index
    %8 = vector.load %arg1[%c0_1, %c0_2, %c0_3] : memref<2x16x128xf32, #tpu.memory_space<vmem>>, vector<2x16x128xf32>
    %9 = vector.shape_cast %8 : vector<2x16x128xf32> to vector<32x128xf32>
    %c0_4 = arith.constant 0 : index
    %c0_5 = arith.constant 0 : index
    %c0_6 = arith.constant 0 : index
    %10 = vector.load %arg2[%c0_4, %c0_5, %c0_6] : memref<2x1x32xf32, #tpu.memory_space<vmem>>, vector<2x1x32xf32>
    %11 = vector.shape_cast %10 : vector<2x1x32xf32> to vector<2x32xf32>
    %c0_7 = arith.constant 0 : index
    %c0_8 = arith.constant 0 : index
    %12 = vector.load %arg4[%c0_7, %c0_8] : memref<32x128xf32, #tpu.memory_space<vmem>>, vector<32x128xf32>
    %cst = arith.constant dense<0.000000e+00> : vector<2x128xf32>
    %13 = tpu.matmul %11, %12, %cst {dimension_numbers = #tpu.dot_dimension_numbers<[1], [0], [0], [1], [0, 0, 1, 1], [], []>} : vector<2x32xf32>, vector<32x128xf32>, vector<2x128xf32> -> vector<2x128xf32>
    %14 = vector.broadcast %4 : vector<1x128xf32> to vector<2x128xf32>
    %15 = arith.addf %13, %14 : vector<2x128xf32>
    %16 = vector.shape_cast %15 : vector<2x128xf32> to vector<2x1x128xf32>
    %17 = vector.broadcast %16 : vector<2x1x128xf32> to vector<2x16x128xf32>
    %18 = arith.addf %8, %17 : vector<2x16x128xf32>
    %19 = vector.shape_cast %18 : vector<2x16x128xf32> to vector<32x128xf32>
    %c0_9 = arith.constant 0 : index
    %c0_10 = arith.constant 0 : index
    %20 = vector.load %arg5[%c0_9, %c0_10] : memref<128x384xf32, #tpu.memory_space<vmem>>, vector<128x384xf32>
    %21 = vector.extract_strided_slice %20 {offsets = [0, 0], sizes = [128, 128], strides = [1, 1]} : vector<128x384xf32> to vector<128x128xf32>
    %cst_11 = arith.constant dense<0.000000e+00> : vector<32x128xf32>
    %22 = tpu.matmul %19, %21, %cst_11 {dimension_numbers = #tpu.dot_dimension_numbers<[1], [0], [0], [1], [0, 0, 1, 1], [], []>} : vector<32x128xf32>, vector<128x128xf32>, vector<32x128xf32> -> vector<32x128xf32>
    %23 = vector.broadcast %1 : vector<1x128xf32> to vector<32x128xf32>
    %24 = arith.addf %22, %23 : vector<32x128xf32>
    %25 = vector.extract_strided_slice %20 {offsets = [0, 128], sizes = [128, 256], strides = [1, 1]} : vector<128x384xf32> to vector<128x256xf32>
    %cst_12 = arith.constant dense<0.000000e+00> : vector<32x256xf32>
    %26 = tpu.matmul %9, %25, %cst_12 {dimension_numbers = #tpu.dot_dimension_numbers<[1], [0], [0], [1], [0, 0, 1, 1], [], []>} : vector<32x128xf32>, vector<128x256xf32>, vector<32x256xf32> -> vector<32x256xf32>
    %27 = vector.extract_strided_slice %26 {offsets = [0, 0], sizes = [32, 128], strides = [1, 1]} : vector<32x256xf32> to vector<32x128xf32>
    %28 = vector.broadcast %2 : vector<1x128xf32> to vector<32x128xf32>
    %29 = arith.addf %27, %28 : vector<32x128xf32>
    %30 = vector.extract_strided_slice %26 {offsets = [0, 128], sizes = [32, 128], strides = [1, 1]} : vector<32x256xf32> to vector<32x128xf32>
    %31 = vector.broadcast %3 : vector<1x128xf32> to vector<32x128xf32>
    %32 = arith.addf %30, %31 : vector<32x128xf32>
    %33 = vector.shape_cast %24 : vector<32x128xf32> to vector<2x16x128xf32>
    %34 = vector.shape_cast %29 : vector<32x128xf32> to vector<2x16x128xf32>
    %35 = vector.shape_cast %32 : vector<32x128xf32> to vector<2x16x128xf32>
    %c0_13 = arith.constant 0 : index
    %c0_14 = arith.constant 0 : index
    %c0_15 = arith.constant 0 : index
    %36 = vector.load %arg3[%c0_13, %c0_14, %c0_15] : memref<2x1x16xf32, #tpu.memory_space<vmem>>, vector<2x1x16xf32>
    %37 = vector.extract_strided_slice %33 {offsets = [0, 0, 0], sizes = [2, 16, 32], strides = [1, 1, 1]} : vector<2x16x128xf32> to vector<2x16x32xf32>
    %38 = vector.extract_strided_slice %34 {offsets = [0, 0, 0], sizes = [2, 16, 32], strides = [1, 1, 1]} : vector<2x16x128xf32> to vector<2x16x32xf32>
    %39 = vector.extract_strided_slice %35 {offsets = [0, 0, 0], sizes = [2, 16, 32], strides = [1, 1, 1]} : vector<2x16x128xf32> to vector<2x16x32xf32>
    %cst_16 = arith.constant dense<0.000000e+00> : vector<2x16x16xf32>
    %40 = tpu.matmul %37, %38, %cst_16 {dimension_numbers = #tpu.dot_dimension_numbers<[2], [2], [1], [1], [0, 0, 0, 1, 1, 1], [0], [0]>} : vector<2x16x32xf32>, vector<2x16x32xf32>, vector<2x16x16xf32> -> vector<2x16x16xf32>
    %cst_17 = arith.constant 0.176776692 : f32
    %41 = vector.broadcast %cst_17 : f32 to vector<2x16x16xf32>
    %42 = arith.mulf %40, %41 : vector<2x16x16xf32>
    %43 = vector.broadcast %36 : vector<2x1x16xf32> to vector<2x16x16xf32>
    %44 = arith.addf %42, %43 : vector<2x16x16xf32>
    %45 = vector.extract_strided_slice %33 {offsets = [0, 0, 32], sizes = [2, 16, 32], strides = [1, 1, 1]} : vector<2x16x128xf32> to vector<2x16x32xf32>
    %46 = vector.extract_strided_slice %34 {offsets = [0, 0, 32], sizes = [2, 16, 32], strides = [1, 1, 1]} : vector<2x16x128xf32> to vector<2x16x32xf32>
    %47 = vector.extract_strided_slice %35 {offsets = [0, 0, 32], sizes = [2, 16, 32], strides = [1, 1, 1]} : vector<2x16x128xf32> to vector<2x16x32xf32>
    %cst_18 = arith.constant dense<0.000000e+00> : vector<2x16x16xf32>
    %48 = tpu.matmul %45, %46, %cst_18 {dimension_numbers = #tpu.dot_dimension_numbers<[2], [2], [1], [1], [0, 0, 0, 1, 1, 1], [0], [0]>} : vector<2x16x32xf32>, vector<2x16x32xf32>, vector<2x16x16xf32> -> vector<2x16x16xf32>
    %cst_19 = arith.constant 0.176776692 : f32
    %49 = vector.broadcast %cst_19 : f32 to vector<2x16x16xf32>
    %50 = arith.mulf %48, %49 : vector<2x16x16xf32>
    %51 = vector.broadcast %36 : vector<2x1x16xf32> to vector<2x16x16xf32>
    %52 = arith.addf %50, %51 : vector<2x16x16xf32>
    %53 = vector.extract_strided_slice %33 {offsets = [0, 0, 64], sizes = [2, 16, 32], strides = [1, 1, 1]} : vector<2x16x128xf32> to vector<2x16x32xf32>
    %54 = vector.extract_strided_slice %34 {offsets = [0, 0, 64], sizes = [2, 16, 32], strides = [1, 1, 1]} : vector<2x16x128xf32> to vector<2x16x32xf32>
    %55 = vector.extract_strided_slice %35 {offsets = [0, 0, 64], sizes = [2, 16, 32], strides = [1, 1, 1]} : vector<2x16x128xf32> to vector<2x16x32xf32>
    %cst_20 = arith.constant dense<0.000000e+00> : vector<2x16x16xf32>
    %56 = tpu.matmul %53, %54, %cst_20 {dimension_numbers = #tpu.dot_dimension_numbers<[2], [2], [1], [1], [0, 0, 0, 1, 1, 1], [0], [0]>} : vector<2x16x32xf32>, vector<2x16x32xf32>, vector<2x16x16xf32> -> vector<2x16x16xf32>
    %cst_21 = arith.constant 0.176776692 : f32
    %57 = vector.broadcast %cst_21 : f32 to vector<2x16x16xf32>
    %58 = arith.mulf %56, %57 : vector<2x16x16xf32>
    %59 = vector.broadcast %36 : vector<2x1x16xf32> to vector<2x16x16xf32>
    %60 = arith.addf %58, %59 : vector<2x16x16xf32>
    %61 = vector.extract_strided_slice %33 {offsets = [0, 0, 96], sizes = [2, 16, 32], strides = [1, 1, 1]} : vector<2x16x128xf32> to vector<2x16x32xf32>
    %62 = vector.extract_strided_slice %34 {offsets = [0, 0, 96], sizes = [2, 16, 32], strides = [1, 1, 1]} : vector<2x16x128xf32> to vector<2x16x32xf32>
    %63 = vector.extract_strided_slice %35 {offsets = [0, 0, 96], sizes = [2, 16, 32], strides = [1, 1, 1]} : vector<2x16x128xf32> to vector<2x16x32xf32>
    %cst_22 = arith.constant dense<0.000000e+00> : vector<2x16x16xf32>
    %64 = tpu.matmul %61, %62, %cst_22 {dimension_numbers = #tpu.dot_dimension_numbers<[2], [2], [1], [1], [0, 0, 0, 1, 1, 1], [0], [0]>} : vector<2x16x32xf32>, vector<2x16x32xf32>, vector<2x16x16xf32> -> vector<2x16x16xf32>
    %cst_23 = arith.constant 0.176776692 : f32
    %65 = vector.broadcast %cst_23 : f32 to vector<2x16x16xf32>
    %66 = arith.mulf %64, %65 : vector<2x16x16xf32>
    %67 = vector.broadcast %36 : vector<2x1x16xf32> to vector<2x16x16xf32>
    %68 = arith.addf %66, %67 : vector<2x16x16xf32>
    %69 = tpu.concatenate %44, %52, %60, %68 in 0 : vector<2x16x16xf32>, vector<2x16x16xf32>, vector<2x16x16xf32>, vector<2x16x16xf32> -> vector<8x16x16xf32>
    %cst_24 = arith.constant dense<0xFF800000> : vector<8x16xf32>
    %70 = vector.multi_reduction <maximumf>, %69, %cst_24 [2] : vector<8x16x16xf32> to vector<8x16xf32>
    %71 = vector.shape_cast %70 : vector<8x16xf32> to vector<8x16x1xf32>
    %72 = vector.broadcast %71 : vector<8x16x1xf32> to vector<8x16x16xf32>
    %73 = arith.subf %69, %72 : vector<8x16x16xf32>
    %74 = math.exp %73 : vector<8x16x16xf32>
    %cst_25 = arith.constant dense<0.000000e+00> : vector<8x16xf32>
    %75 = vector.multi_reduction <add>, %74, %cst_25 [2] : vector<8x16x16xf32> to vector<8x16xf32>
    %76 = vector.shape_cast %75 : vector<8x16xf32> to vector<8x16x1xf32>
    %77 = tpu.reciprocal %76 : vector<8x16x1xf32> -> vector<8x16x1xf32>
    %78 = vector.broadcast %77 : vector<8x16x1xf32> to vector<8x16x16xf32>
    %79 = arith.mulf %74, %78 : vector<8x16x16xf32>
    %80 = vector.extract_strided_slice %79 {offsets = [0, 0, 0], sizes = [2, 16, 16], strides = [1, 1, 1]} : vector<8x16x16xf32> to vector<2x16x16xf32>
    %cst_26 = arith.constant dense<0.000000e+00> : vector<2x16x32xf32>
    %81 = tpu.matmul %80, %39, %cst_26 {dimension_numbers = #tpu.dot_dimension_numbers<[2], [1], [1], [2], [0, 0, 0, 1, 1, 2], [0], [0]>} : vector<2x16x16xf32>, vector<2x16x32xf32>, vector<2x16x32xf32> -> vector<2x16x32xf32>
    %82 = vector.extract_strided_slice %79 {offsets = [2, 0, 0], sizes = [2, 16, 16], strides = [1, 1, 1]} : vector<8x16x16xf32> to vector<2x16x16xf32>
    %cst_27 = arith.constant dense<0.000000e+00> : vector<2x16x32xf32>
    %83 = tpu.matmul %82, %47, %cst_27 {dimension_numbers = #tpu.dot_dimension_numbers<[2], [1], [1], [2], [0, 0, 0, 1, 1, 2], [0], [0]>} : vector<2x16x16xf32>, vector<2x16x32xf32>, vector<2x16x32xf32> -> vector<2x16x32xf32>
    %84 = vector.extract_strided_slice %79 {offsets = [4, 0, 0], sizes = [2, 16, 16], strides = [1, 1, 1]} : vector<8x16x16xf32> to vector<2x16x16xf32>
    %cst_28 = arith.constant dense<0.000000e+00> : vector<2x16x32xf32>
    %85 = tpu.matmul %84, %55, %cst_28 {dimension_numbers = #tpu.dot_dimension_numbers<[2], [1], [1], [2], [0, 0, 0, 1, 1, 2], [0], [0]>} : vector<2x16x16xf32>, vector<2x16x32xf32>, vector<2x16x32xf32> -> vector<2x16x32xf32>
    %86 = vector.extract_strided_slice %79 {offsets = [6, 0, 0], sizes = [2, 16, 16], strides = [1, 1, 1]} : vector<8x16x16xf32> to vector<2x16x16xf32>
    %cst_29 = arith.constant dense<0.000000e+00> : vector<2x16x32xf32>
    %87 = tpu.matmul %86, %63, %cst_29 {dimension_numbers = #tpu.dot_dimension_numbers<[2], [1], [1], [2], [0, 0, 0, 1, 1, 2], [0], [0]>} : vector<2x16x16xf32>, vector<2x16x32xf32>, vector<2x16x32xf32> -> vector<2x16x32xf32>
    %88 = tpu.concatenate %81, %83, %85, %87 in 2 : vector<2x16x32xf32>, vector<2x16x32xf32>, vector<2x16x32xf32>, vector<2x16x32xf32> -> vector<2x16x128xf32>
    %89 = vector.shape_cast %88 : vector<2x16x128xf32> to vector<32x128xf32>
    %c0_30 = arith.constant 0 : index
    %c0_31 = arith.constant 0 : index
    %90 = vector.load %arg6[%c0_30, %c0_31] : memref<128x128xf32, #tpu.memory_space<vmem>>, vector<128x128xf32>
    %cst_32 = arith.constant dense<0.000000e+00> : vector<32x128xf32>
    %91 = tpu.matmul %89, %90, %cst_32 {dimension_numbers = #tpu.dot_dimension_numbers<[1], [0], [0], [1], [0, 0, 1, 1], [], []>} : vector<32x128xf32>, vector<128x128xf32>, vector<32x128xf32> -> vector<32x128xf32>
    %92 = vector.broadcast %5 : vector<1x128xf32> to vector<32x128xf32>
    %93 = arith.addf %91, %92 : vector<32x128xf32>
    %94 = arith.addf %93, %9 : vector<32x128xf32>
    %cst_33 = arith.constant dense<0.000000e+00> : vector<32xf32>
    %95 = vector.multi_reduction <add>, %94, %cst_33 [1] : vector<32x128xf32> to vector<32xf32>
    %96 = vector.shape_cast %95 : vector<32xf32> to vector<32x1xf32>
    %cst_34 = arith.constant 1.280000e+02 : f32
    %97 = vector.broadcast %cst_34 : f32 to vector<32x1xf32>
    %98 = arith.divf %96, %97 : vector<32x1xf32>
    %99 = vector.broadcast %98 : vector<32x1xf32> to vector<32x128xf32>
    %100 = arith.subf %94, %99 : vector<32x128xf32>
    %101 = arith.mulf %100, %100 : vector<32x128xf32>
    %cst_35 = arith.constant dense<0.000000e+00> : vector<32xf32>
    %102 = vector.multi_reduction <add>, %101, %cst_35 [1] : vector<32x128xf32> to vector<32xf32>
    %103 = vector.shape_cast %102 : vector<32xf32> to vector<32x1xf32>
    %cst_36 = arith.constant 1.280000e+02 : f32
    %104 = vector.broadcast %cst_36 : f32 to vector<32x1xf32>
    %105 = arith.divf %103, %104 : vector<32x1xf32>
    %106 = vector.broadcast %98 : vector<32x1xf32> to vector<32x128xf32>
    %107 = arith.subf %94, %106 : vector<32x128xf32>
    %cst_37 = arith.constant 9.99999974E-6 : f32
    %108 = vector.broadcast %cst_37 : f32 to vector<32x1xf32>
    %109 = arith.addf %105, %108 : vector<32x1xf32>
    %110 = math.rsqrt %109 : vector<32x1xf32>
    %111 = vector.broadcast %110 : vector<32x1xf32> to vector<32x128xf32>
    %112 = arith.mulf %107, %111 : vector<32x128xf32>
    %113 = vector.broadcast %6 : vector<1x128xf32> to vector<32x128xf32>
    %114 = arith.mulf %112, %113 : vector<32x128xf32>
    %115 = vector.broadcast %7 : vector<1x128xf32> to vector<32x128xf32>
    %116 = arith.addf %114, %115 : vector<32x128xf32>
    %117 = vector.shape_cast %116 : vector<32x128xf32> to vector<2x16x128xf32>
    %c0_38 = arith.constant 0 : index
    %c0_39 = arith.constant 0 : index
    %c0_40 = arith.constant 0 : index
    %118 = vector.load %arg8[%c0_38, %c0_39, %c0_40] : memref<2x16x128xf32, #tpu.memory_space<vmem>>, vector<2x16x128xf32>
    tpu.vector_store %arg8[%c0_38, %c0_39, %c0_40], %117 {strides = array<i32>} : memref<2x16x128xf32, #tpu.memory_space<vmem>>, vector<2x16x128xf32>,
    return
  }
  func.func @transform_0(%arg0: i32) -> (i32, i32, i32) {
    %c0_i32 = arith.constant 0 : i32
    %c0_i32_0 = arith.constant 0 : i32
    %c0_i32_1 = arith.constant 0 : i32
    return %arg0, %c0_i32, %c0_i32_0 : i32, i32, i32
  }
  func.func @transform_1(%arg0: i32) -> (i32, i32, i32) {
    %c0_i32 = arith.constant 0 : i32
    %c0_i32_0 = arith.constant 0 : i32
    %c0_i32_1 = arith.constant 0 : i32
    return %arg0, %c0_i32, %c0_i32_0 : i32, i32, i32
  }
  func.func @transform_2(%arg0: i32) -> (i32, i32, i32) {
    %c0_i32 = arith.constant 0 : i32
    %c0_i32_0 = arith.constant 0 : i32
    %c0_i32_1 = arith.constant 0 : i32
    return %arg0, %c0_i32, %c0_i32_0 : i32, i32, i32
  }
  func.func @transform_3(%arg0: i32) -> (i32, i32) {
    %c0_i32 = arith.constant 0 : i32
    %c0_i32_0 = arith.constant 0 : i32
    %c0_i32_1 = arith.constant 0 : i32
    return %c0_i32, %c0_i32_0 : i32, i32
  }
  func.func @transform_4(%arg0: i32) -> (i32, i32) {
    %c0_i32 = arith.constant 0 : i32
    %c0_i32_0 = arith.constant 0 : i32
    %c0_i32_1 = arith.constant 0 : i32
    return %c0_i32, %c0_i32_0 : i32, i32
  }
  func.func @transform_5(%arg0: i32) -> (i32, i32) {
    %c0_i32 = arith.constant 0 : i32
    %c0_i32_0 = arith.constant 0 : i32
    %c0_i32_1 = arith.constant 0 : i32
    return %c0_i32, %c0_i32_0 : i32, i32
  }
  func.func @transform_6(%arg0: i32) -> (i32, i32) {
    %c0_i32 = arith.constant 0 : i32
    %c0_i32_0 = arith.constant 0 : i32
    %c0_i32_1 = arith.constant 0 : i32
    return %c0_i32, %c0_i32_0 : i32, i32
  }
  func.func @transform_7(%arg0: i32) -> (i32, i32, i32) {
    %c0_i32 = arith.constant 0 : i32
    %c0_i32_0 = arith.constant 0 : i32
    %c0_i32_1 = arith.constant 0 : i32
    return %arg0, %c0_i32, %c0_i32_0 : i32, i32, i32
  }
}

</mosaic_0001>

<bundles_post_ra>
// kernel: tpu_custom_call.1
= control target key start
LH: loop header
LB: loop body
LE: loop exit
PB: predicated region body
PF: predicated region fallthrough
CT: control target
= control target key end

     0   :  { %12 = vsyncpa [#allocation3], 0  ;;  %s3479_s0 = inlined_call_operand.hbm [shape: f32[2,16,128], index: 0, kind: input, shape index: {}]   ;;  %s3480_s1 = inlined_call_operand.hbm [shape: f32[2,1,32], index: 1, kind: input, shape index: {}]   ;;  %s3481_s2 = inlined_call_operand.vmem [shape: f32[2,1,16], index: 2, kind: input, shape index: {}]   ;;  %s3482_s3 = inlined_call_operand.hbm [shape: f32[32,128], index: 3, kind: input, shape index: {}]   ;;  %s3483_s4 = inlined_call_operand.hbm [shape: f32[128,384], index: 4, kind: input, shape index: {}]   ;;  %s3484_s5 = inlined_call_operand.hbm [shape: f32[128,128], index: 5, kind: input, shape index: {}]   ;;  %s3485_s6 = inlined_call_operand.vmem [shape: f32[7,128], index: 6, kind: input, shape index: {}]   ;;  %s3486_s7 = inlined_call_operand.hbm [shape: f32[2,16,128], index: 7, kind: output, shape index: {}]  }
   0x1   :  { %13 = vsyncpa [#allocation6], 0 }
   0x2   :  { %14 = vsyncpa [#allocation9], 0 }
   0x3   :  { %15 = vsyncpa [#allocation4], 0  ;;  %s2977_s24 = smov [#allocation5]  }
   0x4   :  { %s33_s25 = sshll.u32 %s2977_s24, 4  ;;  %s34_s25 = int_to_ptr.vmem [resolvable:$true] %s33_s25 }
   0x5   :  { %s2857_s26 = scalar_lea.vmem %s34_s25, 32  ;;  %p2862_p1 = scmp.lt.s32.totalorder %s34_s25, %s34_s25 }
   0x6   :  { %p2858_p0 = scmp.ne.s32.totalorder %s34_s25, %s2857_s26  ;;  %p2863_p2 = scmp.lt.s32.totalorder %s2857_s26, %s2857_s26 }
   0x8   :  { %p2864_p3 = por %p2863_p2, %p2862_p1 }
   0xa   :  { %p2865_p4 = pnand %p2864_p3, %p2858_p0 }
   0xc   :  { %2868 = shalt.err (!%p2865_p4)
}
   0xd   :  { %s2978_s27 = smov 16   ;;  %s2979_s28 = smov 1  }
   0xe   :  { %39 = dma.hbm_to_vmem [thread:$0]  %s3480_s1, 32, %s34_s25, [#allocation6], %s2978_s27, %s2978_s27, %s2979_s28  }
   0xf   :  { %s2980_s8 = smov [#allocation8]  }
  0x10   :  { %s59_s9 = sshll.u32 %s2980_s8, 4  ;;  %s60_s9 = int_to_ptr.vmem [resolvable:$true] %s59_s9 }
  0x11   :  { %s2877_s10 = scalar_lea.vmem %s60_s9, 6144  ;;  %p2882_p6 = scmp.lt.s32.totalorder %s60_s9, %s60_s9 }
  0x12   :  { %p2878_p5 = scmp.ne.s32.totalorder %s60_s9, %s2877_s10  ;;  %p2883_p7 = scmp.lt.s32.totalorder %s2877_s10, %s2877_s10 }
  0x14   :  { %p2884_p8 = por %p2883_p7, %p2882_p6 }
  0x16   :  { %p2885_p9 = pnand %p2884_p8, %p2878_p5 }
  0x18   :  { %2888 = shalt.err (!%p2885_p9)
}
  0x19   :  { %s2981_s11 = smov 384   ;;  %s2982_s12 = smov 24  }
  0x1a   :  { %65 = dma.hbm_to_vmem [thread:$0]  %s3483_s4, 6144, %s60_s9, [#allocation9], %s2981_s11, %s2981_s11, %s2982_s12  }
  0x1b   :  { %s2983_s15 = smov [#allocation2]  }
  0x1c   :  { %s21_s16 = sshll.u32 %s2983_s15, 4  ;;  %s22_s16 = int_to_ptr.vmem [resolvable:$true] %s21_s16 }
  0x1d   :  { %s2897_s1 = scalar_lea.vmem %s22_s16, 512  ;;  %p2902_p11 = scmp.lt.s32.totalorder %s22_s16, %s22_s16 }
  0x1e   :  { %p2898_p10 = scmp.ne.s32.totalorder %s22_s16, %s2897_s1  ;;  %p2903_p12 = scmp.lt.s32.totalorder %s2897_s1, %s2897_s1 }
  0x20   :  { %p2904_p13 = por %p2903_p12, %p2902_p11 }
  0x22   :  { %p2905_p0 = pnand %p2904_p13, %p2898_p10 }
  0x24   :  { %2908 = shalt.err (!%p2905_p0)
}
  0x25   :  { %s2984_s17 = smov 128   ;;  %s2985_s18 = smov 8  }
  0x26   :  { %27 = dma.hbm_to_vmem [thread:$0]  %s3479_s0, 512, %s22_s16, [#allocation3], %s2984_s17, %s2984_s17, %s2985_s18  }
  0x27   :  { %s2986_s4 = smov [#allocation7]   ;;  %s2987_s22 = smov [#allocation10]  }
  0x28   :  { %s47_s21 = sshll.u32 %s2986_s4, 4  ;;  %s71_s23 = sshll.u32 %s2987_s22, 4  ;;  %s48_s21 = int_to_ptr.vmem [resolvable:$true] %s47_s21  ;;  %s72_s23 = int_to_ptr.vmem [resolvable:$true] %s71_s23 }
  0x29   :  { %s2917_s24 = scalar_lea.vmem %s48_s21, 512  ;;  %p2922_p2 = scmp.lt.s32.totalorder %s48_s21, %s48_s21 }
  0x2a   :  { %p2918_p1 = scmp.ne.s32.totalorder %s48_s21, %s2917_s24  ;;  %p2923_p3 = scmp.lt.s32.totalorder %s2917_s24, %s2917_s24 }
  0x2c   :  { %p2924_p4 = por %p2923_p3, %p2922_p2 }
  0x2e   :  { %p2925_p5 = pnand %p2924_p4, %p2918_p1 }
  0x30   :  { %2928 = shalt.err (!%p2925_p5)
}
  0x31   :  { %53 = dma.hbm_to_vmem [thread:$0]  %s3482_s3, 512, %s48_s21, [#allocation6], %s2984_s17, %s2984_s17, %s2985_s18  }
  0x32   :  { %s2937_s0 = scalar_lea.vmem %s72_s23, 2048  ;;  %p2942_p7 = scmp.lt.s32.totalorder %s72_s23, %s72_s23 }
  0x33   :  { %p2938_p6 = scmp.ne.s32.totalorder %s72_s23, %s2937_s0  ;;  %p2943_p8 = scmp.lt.s32.totalorder %s2937_s0, %s2937_s0 }
  0x35   :  { %p2944_p9 = por %p2943_p8, %p2942_p7 }
  0x37   :  { %p2945_p10 = pnand %p2944_p9, %p2938_p6 }
  0x39   :  { %2948 = shalt.err (!%p2945_p10)
}
  0x3a   :  { %77 = dma.hbm_to_vmem [thread:$0]  %s3484_s5, 2048, %s72_s23, [#allocation9], %s2984_s17, %s2984_s17, %s2985_s18  }
  0x3b   :  { %2969 = dma.done.wait [#allocation3], 512  }
  0x3c   :  { %2970 = vsyncadd [#allocation3], 4294966784 }
  0x3d   :  { %2971 = dma.done.wait [#allocation6], 544  }
  0x3e   :  { %2972 = vsyncadd [#allocation6], 4294966752 }
  0x3f   :  { %2973 = dma.done.wait [#allocation9], 8192  }
  0x40   :  { %2974 = vsyncadd [#allocation9], 4294959104  ;;  %v106_v0 = vlaneseq  ;;  %v2988_v1 = vmov 0.0   ;;  %vm2989_vm0 = vmmov 0   ;;  %v2990_v2 = vmov 1966171168  }
  0x41   :  { %2525 = vmatprep.subr.mxu1 %v2988_v1  ;;  %2533 = vmatprep.mubr.msk.f32.mxu1 %vm2989_vm0, %v2988_v1  ;;  %v114_v3 = vunpack.c.l.s4 %v2990_v2  ;;  %v105_v6 = vld [vmem:[#allocation7 + $0x18] sm:$0xff]  ;;  %v104_v7 = vld [vmem:[#allocation7 + $0x10] sm:$0xff]  ;;  %v103_v9 = vld [vmem:[#allocation7 + $0x8] sm:$0xff]  ;;  %vm127_vm1 = vcmask 261120   ;;  %s2991_s29 = smov 96   ;;  %s2992_s30 = smov 64  }
  0x42   :  { %438 = vmatprep.mubr.f32.mxu0 %v2988_v1  ;;  %v3062_v4 = vshrl.u32 %v106_v0, 7  ;;  %2526 = vmatpush3.msra.mxu1 %v105_v6  ;;  %v100_v10 = vld [vmem:[#allocation5] sm:$0x1]  ;;  %v101_v11 = vld [vmem:[#allocation5 + $0x1] sm:$0x1]  ;;  %v283_v14 = vld [vmem:[#allocation8 + $0x170] sm:$0xff] }
  0x43   :  { %v115_v5 = vunpack.c.0.s8 %v114_v3  ;;  %2527 = vmatprep.subr.mxu1 %v2988_v1  ;;  %v112_v12 = vcombine.low %v100_v10, %v101_v11  ;;  %v284_v13 = vld [vmem:[#allocation8 + $0x178] sm:$0xff]  ;;  %v281_v15 = vld [vmem:[#allocation8 + $0x160] sm:$0xff]  ;;  %v278_v19 = vld [vmem:[#allocation8 + $0x148] sm:$0xff]  ;;  %s2993_s8 = smov 32   ;;  %vm1245_vm2 = vcmask 130048   ;;  %vm2162_vm3 = vcmask 523264  }
  0x44   :  { %2528 = vmatpush3.msra.mxu1 %v104_v7  ;;  %374 = vmatprep.subr.mxu0 %v284_v13  ;;  %v280_v16 = vld [vmem:[#allocation8 + $0x158] sm:$0xff]  ;;  %v102_v17 = vld [vmem:[#allocation7] sm:$0xff]  ;;  %v275_v22 = vld [vmem:[#allocation8 + $0x130] sm:$0xff]  ;;  %v225_v13 = vsub.s32 0, %v3062_v4  ;;  %vm2167_vm4 = vcmask 785408  }
  0x45   :  { %v3065_v8 = vsub.s32 %v115_v5, %v3062_v4  ;;  %2529 = vmatprep.subr.mxu1 %v2988_v1  ;;  %375 = vmatpush1.msra.mxu0 %v283_v14  ;;  %v277_v20 = vld [vmem:[#allocation8 + $0x140] sm:$0xff]  ;;  %v274_v23 = vld [vmem:[#allocation8 + $0x128] sm:$0xff]  ;;  %v272_v24 = vld [vmem:[#allocation8 + $0x118] sm:$0xff] }
  0x46   :  { %2530 = vmatpush3.msra.mxu1 %v103_v9  ;;  %376 = vmatprep.subr.mxu0 %v281_v15  ;;  %v271_v25 = vld [vmem:[#allocation8 + $0x110] sm:$0xff]  ;;  %v269_v26 = vld [vmem:[#allocation8 + $0x100] sm:$0xff]  ;;  %v268_v27 = vld [vmem:[#allocation8 + $0xf8] sm:$0xff] }
  0x47   :  { %v119_v18 = vrot.slane %v112_v12, %v3065_v8  ;;  %2531 = vmatprep.subr.mxu1 %v2988_v1  ;;  %377 = vmatpush1.msra.mxu0 %v280_v16  ;;  %v266_v28 = vld [vmem:[#allocation8 + $0xe8] sm:$0xff]  ;;  %v265_v29 = vld [vmem:[#allocation8 + $0xe0] sm:$0xff]  ;;  %v279_v31 = vld [vmem:[#allocation8 + $0x150] sm:$0xff] }
  0x48   :  { %2532 = vmatpush3.msra.mxu1 %v102_v17  ;;  %378 = vmatprep.subr.mxu0 %v278_v19  ;;  %v282_v30 = vld [vmem:[#allocation8 + $0x168] sm:$0xff]  ;;  %v263_v32 = vld [vmem:[#allocation8 + $0xd0] sm:$0xff]  ;;  %v276_v34 = vld [vmem:[#allocation8 + $0x138] sm:$0xff] }
  0x49   :  { %v126_v21 = vrot.slane %v119_v18, %v3065_v8  ;;  %379 = vmatpush1.msra.mxu0 %v277_v20  ;;  %2536 = vmatprep.subr.mxu1 %v282_v30  ;;  %v262_v33 = vld [vmem:[#allocation8 + $0xc8] sm:$0xff]  ;;  %v260_v35 = vld [vmem:[#allocation8 + $0xb8] sm:$0xff]  ;;  %v259_v36 = vld [vmem:[#allocation8 + $0xb0] sm:$0xff] }
  0x4a   :  { %380 = vmatprep.subr.mxu0 %v275_v22  ;;  %v273_v37 = vld [vmem:[#allocation8 + $0x120] sm:$0xff]  ;;  %v256_v39 = vld [vmem:[#allocation8 + $0x98] sm:$0xff]  ;;  %v270_v40 = vld [vmem:[#allocation8 + $0x108] sm:$0xff] }
  0x4b   :  { %2534 = vmatmul.mubr.msk.f32.vlgmr.msra.gmra.mxu1 %vm127_vm1, %v126_v21  ;;  %381 = vmatpush1.msra.mxu0 %v274_v23  ;;  %v257_v38 = vld [vmem:[#allocation8 + $0xa0] sm:$0xff]  ;;  %v254_v41 = vld [vmem:[#allocation8 + $0x88] sm:$0xff]  ;;  %v267_v43 = vld [vmem:[#allocation8 + $0xf0] sm:$0xff]  ;;  %v465_v23 = vsub.s32 1, %v3062_v4 }
  0x4c   :  { %382 = vmatprep.subr.mxu0 %v272_v24  ;;  %2537 = vmatpush3.msra.mxu1 %v282_v30  ;;  %v253_v42 = vld [vmem:[#allocation8 + $0x80] sm:$0xff]  ;;  %v251_v44 = vld [vmem:[#allocation8 + $0x70] sm:$0xff]  ;;  %v250_v45 = vld [vmem:[#allocation8 + $0x68] sm:$0xff] }
  0x4d   :  { %383 = vmatpush1.msra.mxu0 %v271_v25  ;;  %2538 = vmatprep.subr.mxu1 %v279_v31  ;;  %v264_v46 = vld [vmem:[#allocation8 + $0xd8] sm:$0xff]  ;;  %v247_v48 = vld [vmem:[#allocation8 + $0x50] sm:$0xff]  ;;  %v261_v49 = vld [vmem:[#allocation8 + $0xc0] sm:$0xff] }
  0x4e   :  { %384 = vmatprep.subr.mxu0 %v269_v26  ;;  %2539 = vmatpush3.msra.mxu1 %v279_v31  ;;  %v248_v47 = vld [vmem:[#allocation8 + $0x58] sm:$0xff]  ;;  %v245_v50 = vld [vmem:[#allocation8 + $0x40] sm:$0xff]  ;;  %v258_v52 = vld [vmem:[#allocation8 + $0xa8] sm:$0xff] }
  0x4f   :  { %385 = vmatpush1.msra.mxu0 %v268_v27  ;;  %2540 = vmatprep.subr.mxu1 %v276_v34  ;;  %v244_v51 = vld [vmem:[#allocation8 + $0x38] sm:$0xff]  ;;  %v242_v53 = vld [vmem:[#allocation8 + $0x28] sm:$0xff]  ;;  %v241_v54 = vld [vmem:[#allocation8 + $0x20] sm:$0xff] }
  0x50   :  { %386 = vmatprep.subr.mxu0 %v266_v28  ;;  %2541 = vmatpush3.msra.mxu1 %v276_v34  ;;  %v255_v55 = vld [vmem:[#allocation8 + $0x90] sm:$0xff]  ;;  %v238_v57 = vld [vmem:[#allocation8 + $0x8] sm:$0xff]  ;;  %v96_v58 = vld [vmem:[#allocation2] sm:$0xff] }
  0x51   :  { %387 = vmatpush1.msra.mxu0 %v265_v29  ;;  %2542 = vmatprep.subr.mxu1 %v273_v37  ;;  %v239_v56 = vld [vmem:[#allocation8 + $0x10] sm:$0xff]  ;;  %v97_v59 = vld [vmem:[#allocation2 + $0x8] sm:$0xff]  ;;  %v252_v61 = vld [vmem:[#allocation8 + $0x78] sm:$0xff] }
  0x52   :  { %388 = vmatprep.subr.mxu0 %v263_v32  ;;  %2543 = vmatpush3.msra.mxu1 %v273_v37  ;;  %v98_v60 = vld [vmem:[#allocation2 + $0x10] sm:$0xff]  ;;  %v249_v62 = vld [vmem:[#allocation8 + $0x60] sm:$0xff]  ;;  %v99_v63 = vld [vmem:[#allocation2 + $0x18] sm:$0xff] }
  0x53   :  { %389 = vmatpush1.msra.mxu0 %v262_v33  ;;  %2544 = vmatprep.subr.mxu1 %v270_v40  ;;  %v246_v0 = vld [vmem:[#allocation8 + $0x48] sm:$0xff]  ;;  %v243_v2 = vld [vmem:[#allocation8 + $0x30] sm:$0xff]  ;;  %v240_v3 = vld [vmem:[#allocation8 + $0x18] sm:$0xff] }
  0x54   :  { %390 = vmatprep.subr.mxu0 %v260_v35  ;;  %2545 = vmatpush3.msra.mxu1 %v270_v40  ;;  %v237_v5 = vld [vmem:[#allocation8] sm:$0xff] }
  0x55   :  { %391 = vmatpush1.msra.mxu0 %v259_v36  ;;  %2546 = vmatprep.subr.mxu1 %v267_v43  ;;  %v3080_v6 = vld [vmem:[%s3485_s6] sm:$0x7f] }
  0x56   :  { %392 = vmatprep.subr.mxu0 %v257_v38  ;;  %2547 = vmatpush3.msra.mxu1 %v267_v43  ;;  %v466_v24 = vrot.slane %v3080_v6, %v465_v23  ;;  %v288_v40 = vrot.slane %v3080_v6, %v225_v13 }
  0x57   :  { %393 = vmatpush1.msra.mxu0 %v256_v39  ;;  %2548 = vmatprep.subr.mxu1 %v264_v46 }
  0x58   :  { %394 = vmatprep.subr.mxu0 %v254_v41  ;;  %2549 = vmatpush3.msra.mxu1 %v264_v46 }
  0x59   :  { %395 = vmatpush1.msra.mxu0 %v253_v42  ;;  %2550 = vmatprep.subr.mxu1 %v261_v49 }
  0x5a   :  { %396 = vmatprep.subr.mxu0 %v251_v44  ;;  %2551 = vmatpush3.msra.mxu1 %v261_v49 }
  0x5b   :  { %397 = vmatpush1.msra.mxu0 %v250_v45  ;;  %2552 = vmatprep.subr.mxu1 %v258_v52 }
  0x5c   :  { %398 = vmatprep.subr.mxu0 %v248_v47  ;;  %2553 = vmatpush3.msra.mxu1 %v258_v52 }
  0x5d   :  { %399 = vmatpush1.msra.mxu0 %v247_v48  ;;  %2554 = vmatprep.subr.mxu1 %v255_v55 }
  0x5e   :  { %400 = vmatprep.subr.mxu0 %v245_v50  ;;  %2555 = vmatpush3.msra.mxu1 %v255_v55 }
  0x5f   :  { %401 = vmatpush1.msra.mxu0 %v244_v51  ;;  %2556 = vmatprep.subr.mxu1 %v252_v61  ;;  %v473_v51 = vsub.s32 2, %v3062_v4 }
  0x60   :  { %402 = vmatprep.subr.mxu0 %v242_v53  ;;  %2557 = vmatpush3.msra.mxu1 %v252_v61 }
  0x61   :  { %403 = vmatpush1.msra.mxu0 %v241_v54  ;;  %2558 = vmatprep.subr.mxu1 %v249_v62  ;;  %v474_v52 = vrot.slane %v3080_v6, %v473_v51 }
  0x62   :  { %404 = vmatprep.subr.mxu0 %v239_v56  ;;  %2559 = vmatpush3.msra.mxu1 %v249_v62 }
  0x63   :  { %405 = vmatpush1.msra.mxu0 %v238_v57  ;;  %2560 = vmatprep.subr.mxu1 %v246_v0 }
  0x64   :  { %439 = vmatmul.mubr.f32.vlgmr.msra.gmra.mxu0 %v96_v58  ;;  %2561 = vmatpush3.msra.mxu1 %v246_v0 }
  0x65   :  { %444 = vmatprep.mubr.f32.mxu0 %v2988_v1  ;;  %2562 = vmatprep.subr.mxu1 %v243_v2 }
  0x66   :  { %2563 = vmatpush3.msra.mxu1 %v243_v2 }
  0x67   :  { %2564 = vmatprep.subr.mxu1 %v240_v3 }
  0x68   :  { %445 = vmatmul.mubr.f32.gmra.mxu0 %v97_v59  ;;  %2565 = vmatpush3.msra.mxu1 %v240_v3 }
  0x69   :  { %450 = vmatprep.mubr.f32.mxu0 %v2988_v1  ;;  %2566 = vmatprep.subr.mxu1 %v237_v5 }
  0x6a   :  { %2567 = vmatpush3.msra.mxu1 %v237_v5 }
  0x6c   :  { %451 = vmatmul.mubr.f32.gmra.mxu0 %v98_v60 }
  0x6d   :  { %456 = vmatprep.mubr.f32.mxu0 %v2988_v1  ;;  %v108_v1 = vsub.s32 3, %v3062_v4 }
  0x6f   :  { %v109_v7 = vrot.slane %v3080_v6, %v108_v1 }
  0x70   :  { %457 = vmatmul.mubr.f32.gmra.mxu0 %v99_v63 }
 0x10b   :  { %v196_v9 = vpop.f32.mrf.mxu1 }
 0x10c   :  { %v197_v10 = vadd.f32 %v196_v9, %v109_v7 }
 0x10d   :  { %v2535_v11 = vpop.f32.mrf.mxu1 }
 0x10e   :  { %v207_v12 = vrot.slane %v197_v10, %v3065_v8 }
 0x110   :  { %v208_v14 = vcombine.high %v207_v12, %v207_v12  ;;  %v215_v15 = vrot.slane %v207_v12, %v3065_v8 }
 0x112   :  { %v222_v16 = vrot.slane %v208_v14, %v3065_v8  ;;  %v226_v17 = vrot.slane %v215_v15, %v225_v13 }
 0x114   :  { %v233_v18 = vadd.f32 %v226_v17, %v96_v58  ;;  %v234_v19 = vadd.f32 %v226_v17, %v97_v59  ;;  %v230_v20 = vrot.slane %v222_v16, %v225_v13  ;;  %v2374_v16 = vld [vmem:[%s3481_s2] ss:$0 sm:$0xff] }
 0x116   :  { %2568 = vmatprep.mubr.f32.mxu1 %v233_v18  ;;  %v235_v21 = vadd.f32 %v230_v20, %v98_v60  ;;  %v236_v22 = vadd.f32 %v230_v20, %v99_v63 }
 0x117   :  { %2569 = vmatmul.mubr.f32.vlgmr.msra.gmra.mxu1 %v234_v19 }
 0x118   :  { %2571 = vmatprep.mubr.f32.mxu1 %v235_v21 }
 0x11b   :  { %2572 = vmatmul.mubr.f32.gmra.mxu1 %v236_v22 }
 0x124   :  { %v440_v25 = vpop.f32.mrf.mxu0 }
 0x125   :  { %v467_v26 = vadd.f32 %v466_v24, %v440_v25  ;;  %v3222_v25 = vld [vmem:[%s3481_s2 + $0x1] ss:$0 sm:$0xff] }
 0x126   :  { %v3089_v27 = vpop.f32.mrf.mxu0 }
 0x127   :  { %679 = vrot.lane.b32.xlu0 %v467_v26, %s2991_s29  ;;  %v3144_v53 = vadd.f32 %v474_v52, %v3089_v27 }
 0x128   :  { %v446_v8 = vpop.f32.mrf.mxu0 }
 0x129   :  { %v468_v28 = vadd.f32 %v466_v24, %v446_v8 }
 0x12a   :  { %v3092_v29 = vpop.f32.mrf.mxu0 }
 0x12b   :  { %869 = vrot.lane.b32.xlu0 %v467_v26, %s2992_s30  ;;  %2574 = vmatprep.subr.msk.mxu1 %vm127_vm1, %v468_v28  ;;  %v3153_v55 = vadd.f32 %v474_v52, %v3092_v29 }
 0x12c   :  { %2575 = vmatpush3.xpose.msk.msra.mxu1 %vm127_vm1, %v468_v28  ;;  %1061 = vrot.lane.b32.xlu1 %v468_v28, %s2993_s8  ;;  %v452_v30 = vpop.f32.mrf.mxu0 }
 0x12d   :  { %2576 = vmatprep.subr.msk.mxu1 %vm127_vm1, %v467_v26  ;;  %v469_v31 = vadd.f32 %v466_v24, %v452_v30 }
 0x12e   :  { %v454_v32 = vpop.f32.mrf.mxu0 }
 0x12f   :  { %681 = vrot.lane.b32.xlu0 %v468_v28, %s2991_s29  ;;  %v3149_v54 = vadd.f32 %v474_v52, %v454_v32 }
 0x130   :  { %2577 = vmatpush3.xpose.msk.msra.mxu1 %vm127_vm1, %v467_v26  ;;  %770 = vrot.lane.b32.xlu1 %v469_v31, %s2991_s29  ;;  %v458_v33 = vpop.f32.mrf.mxu0 }
 0x131   :  { %v470_v34 = vadd.f32 %v466_v24, %v458_v33 }
 0x132   :  { %v460_v56 = vpop.f32.mrf.mxu0 }
 0x133   :  { %871 = vrot.lane.b32.xlu0 %v468_v28, %s2992_s30  ;;  %2581 = vmatprep.subr.msk.mxu1 %vm127_vm1, %v470_v34  ;;  %v3159_v57 = vadd.f32 %v474_v52, %v460_v56 }
 0x134   :  { %772 = vrot.lane.b32.xlu1 %v470_v34, %s2991_s29 }
 0x137   :  { %960 = vrot.lane.b32.xlu0 %v469_v31, %s2992_s30 }
 0x138   :  { %962 = vrot.lane.b32.xlu1 %v470_v34, %s2992_s30 }
 0x199   :  { %v680_v35 = vpop.permute.xlu0 %679 }
 0x19d   :  { %v870_v36 = vpop.permute.xlu0 %869 }
 0x19e   :  { %v3110_v39 = vpop.permute.xlu1 %1061 }
 0x1a1   :  { %v682_v37 = vpop.permute.xlu0 %681 }
 0x1a2   :  { %v771_v49 = vpop.permute.xlu1 %770 }
 0x1a5   :  { %v872_v38 = vpop.permute.xlu0 %871 }
 0x1a6   :  { %2602 = vmatprep.subr.msk.mxu0 %vm127_vm1, %v872_v38  ;;  %v773_v50 = vpop.permute.xlu1 %772 }
 0x1a7   :  { %2603 = vmatpush3.xpose.msk.msra.mxu0 %vm127_vm1, %v872_v38 }
 0x1a8   :  { %2604 = vmatprep.subr.msk.mxu0 %vm127_vm1, %v870_v36 }
 0x1a9   :  { %v961_v58 = vpop.permute.xlu0 %960 }
 0x1aa   :  { %v963_v59 = vpop.permute.xlu1 %962 }
 0x1ab   :  { %2605 = vmatpush3.xpose.msk.msra.mxu0 %vm127_vm1, %v870_v36 }
 0x1ac   :  { %2616 = vmatprep.subr.msk.mxu0 %vm127_vm1, %v3110_v39 }
 0x1d7   :  { %v2570_v41 = vpop.f32.mrf.mxu1 }
 0x1d8   :  { %v361_v42 = vadd.f32 %v2570_v41, %v288_v40 }
 0x1d9   :  { %v355_v43 = vpop.f32.mrf.mxu1 }
 0x1da   :  { %v356_v44 = vadd.f32 %v355_v43, %v288_v40  ;;  %677 = vrot.lane.b32.xlu0 %v361_v42, %s2991_s29 }
 0x1db   :  { %v2573_v45 = vpop.f32.mrf.mxu1 }
 0x1dc   :  { %675 = vrot.lane.b32.xlu1 %v356_v44, %s2991_s29  ;;  %2578 = vmatprep.mubr.msk.f32.mxu1 %vm127_vm1, %v356_v44  ;;  %v371_v48 = vadd.f32 %v2573_v45, %v288_v40 }
 0x1dd   :  { %v365_v46 = vpop.f32.mrf.mxu1  ;;  %2579 = vmatmul.mubr.msk.f32.vlgmr.msra.gmra.mxu1 %vm127_vm1, %v361_v42 }
 0x1de   :  { %v366_v47 = vadd.f32 %v365_v46, %v288_v40  ;;  %2582 = vmatpush3.xpose.msk.msra.mxu1 %vm127_vm1, %v470_v34  ;;  %867 = vrot.lane.b32.xlu0 %v361_v42, %s2992_s30 }
 0x1df   :  { %2583 = vmatprep.subr.msk.mxu1 %vm127_vm1, %v469_v31 }
 0x1e0   :  { %865 = vrot.lane.b32.xlu1 %v356_v44, %s2992_s30  ;;  %2585 = vmatprep.mubr.msk.f32.mxu1 %vm127_vm1, %v366_v47 }
 0x1e2   :  { %2584 = vmatpush3.xpose.msk.msra.mxu1 %vm127_vm1, %v469_v31  ;;  %768 = vrot.lane.b32.xlu0 %v371_v48, %s2991_s29 }
 0x1e3   :  { %2588 = vmatprep.subr.msk.mxu1 %vm127_vm1, %v682_v37 }
 0x1e4   :  { %1152 = vrot.lane.b32.xlu1 %v470_v34, %s2993_s8 }
 0x1e5   :  { %2586 = vmatmul.mubr.msk.f32.vlgmr.msra.gmra.mxu1 %vm127_vm1, %v371_v48 }
 0x1e6   :  { %1059 = vrot.lane.b32.xlu0 %v467_v26, %s2993_s8  ;;  %2589 = vmatpush3.xpose.msk.msra.mxu1 %vm127_vm1, %v682_v37 }
 0x1e7   :  { %2590 = vmatprep.subr.msk.mxu1 %vm127_vm1, %v680_v35 }
 0x1e8   :  { %766 = vrot.lane.b32.xlu1 %v366_v47, %s2991_s29 }
 0x1ea   :  { %958 = vrot.lane.b32.xlu0 %v371_v48, %s2992_s30  ;;  %2591 = vmatpush3.xpose.msk.msra.mxu1 %vm127_vm1, %v680_v35 }
 0x1eb   :  { %2595 = vmatprep.subr.msk.mxu1 %vm127_vm1, %v773_v50 }
 0x1ec   :  { %1055 = vrot.lane.b32.xlu1 %v356_v44, %s2993_s8 }
 0x1ee   :  { %1057 = vrot.lane.b32.xlu0 %v361_v42, %s2993_s8 }
 0x1f0   :  { %956 = vrot.lane.b32.xlu1 %v366_v47, %s2992_s30 }
 0x1f2   :  { %1146 = vrot.lane.b32.xlu0 %v366_v47, %s2993_s8 }
 0x1f4   :  { %1150 = vrot.lane.b32.xlu1 %v469_v31, %s2993_s8 }
 0x1f6   :  { %1586 = vrot.lane.b32.xlu0 %v3144_v53, %s2991_s29 }
 0x1f8   :  { %1148 = vrot.lane.b32.xlu1 %v371_v48, %s2993_s8 }
 0x1fa   :  { %1675 = vrot.lane.b32.xlu0 %v3149_v54, %s2991_s29 }
 0x1fc   :  { %1588 = vrot.lane.b32.xlu1 %v3153_v55, %s2991_s29 }
 0x200   :  { %1677 = vrot.lane.b32.xlu1 %v3159_v57, %s2991_s29 }
 0x204   :  { %1764 = vrot.lane.b32.xlu1 %v3153_v55, %s2992_s30 }
 0x208   :  { %1762 = vrot.lane.b32.xlu1 %v3144_v53, %s2992_s30 }
 0x24c   :  { %v678_v60 = vpop.permute.xlu0 %677 }
 0x24e   :  { %v676_v61 = vpop.permute.xlu1 %675 }
 0x24f   :  { %2592 = vmatprep.mubr.msk.f32.mxu1 %vm127_vm1, %v676_v61 }
 0x250   :  { %v868_v62 = vpop.permute.xlu0 %867  ;;  %2593 = vmatmul.mubr.msk.f32.vlgmr.msra.gmra.mxu1 %vm127_vm1, %v678_v60 }
 0x251   :  { %2596 = vmatpush3.xpose.msk.msra.mxu1 %vm127_vm1, %v773_v50 }
 0x252   :  { %2597 = vmatprep.subr.msk.mxu1 %vm127_vm1, %v771_v49  ;;  %v866_v63 = vpop.permute.xlu1 %865 }
 0x253   :  { %2606 = vmatprep.mubr.msk.f32.mxu0 %vm127_vm1, %v866_v63 }
 0x254   :  { %2607 = vmatmul.mubr.msk.f32.vlgmr.msra.gmra.mxu0 %vm127_vm1, %v868_v62  ;;  %v769_v0 = vpop.permute.xlu0 %768 }
 0x255   :  { %2617 = vmatpush3.xpose.msk.msra.mxu0 %vm127_vm1, %v3110_v39  ;;  %2598 = vmatpush3.xpose.msk.msra.mxu1 %vm127_vm1, %v771_v49 }
 0x256   :  { %2609 = vmatprep.subr.msk.mxu1 %vm127_vm1, %v963_v59  ;;  %v1153_v2 = vpop.permute.xlu1 %1152 }
 0x258   :  { %v1060_v3 = vpop.permute.xlu0 %1059 }
 0x259   :  { %2618 = vmatprep.subr.msk.mxu0 %vm127_vm1, %v1060_v3 }
 0x25a   :  { %2619 = vmatpush3.xpose.msk.msra.mxu0 %vm127_vm1, %v1060_v3  ;;  %v767_v5 = vpop.permute.xlu1 %766 }
 0x25b   :  { %2599 = vmatprep.mubr.msk.f32.mxu1 %vm127_vm1, %v767_v5  ;;  %2630 = vmatprep.subr.mxu0 %v3153_v55 }
 0x25c   :  { %v959_v1 = vpop.permute.xlu0 %958  ;;  %2600 = vmatmul.mubr.msk.f32.vlgmr.msra.gmra.mxu1 %vm127_vm1, %v769_v0 }
 0x25d   :  { %2610 = vmatpush3.xpose.msk.msra.mxu1 %vm127_vm1, %v963_v59 }
 0x25e   :  { %2611 = vmatprep.subr.msk.mxu1 %vm127_vm1, %v961_v58  ;;  %v1056_v6 = vpop.permute.xlu1 %1055 }
 0x25f   :  { %2620 = vmatprep.mubr.msk.f32.mxu0 %vm127_vm1, %v1056_v6 }
 0x260   :  { %v1058_v7 = vpop.permute.xlu0 %1057 }
 0x261   :  { %2612 = vmatpush3.xpose.msk.msra.mxu1 %vm127_vm1, %v961_v58  ;;  %2621 = vmatmul.mubr.msk.f32.vlgmr.msra.gmra.mxu0 %vm127_vm1, %v1058_v7 }
 0x262   :  { %2623 = vmatprep.subr.msk.mxu1 %vm127_vm1, %v1153_v2  ;;  %2631 = vmatpush3.msra.mxu0 %v3153_v55  ;;  %v957_v9 = vpop.permute.xlu1 %956 }
 0x263   :  { %2632 = vmatprep.subr.mxu0 %v3144_v53  ;;  %2613 = vmatprep.mubr.msk.f32.mxu1 %vm127_vm1, %v957_v9 }
 0x264   :  { %2633 = vmatpush3.msra.mxu0 %v3144_v53  ;;  %v1147_v10 = vpop.permute.xlu0 %1146  ;;  %2614 = vmatmul.mubr.msk.f32.vlgmr.msra.gmra.mxu1 %vm127_vm1, %v959_v1 }
 0x265   :  { %2624 = vmatpush3.xpose.msk.msra.mxu1 %vm127_vm1, %v1153_v2  ;;  %2627 = vmatprep.mubr.msk.f32.mxu1 %vm127_vm1, %v1147_v10 }
 0x266   :  { %v1151_v11 = vpop.permute.xlu1 %1150 }
 0x267   :  { %2625 = vmatprep.subr.msk.mxu1 %vm127_vm1, %v1151_v11 }
 0x269   :  { %2626 = vmatpush3.xpose.msk.msra.mxu1 %vm127_vm1, %v1151_v11 }
 0x26a   :  { %2637 = vmatprep.subr.mxu1 %v3159_v57  ;;  %v1149_v12 = vpop.permute.xlu1 %1148 }
 0x26c   :  { %2628 = vmatmul.mubr.msk.f32.vlgmr.msra.gmra.mxu1 %vm127_vm1, %v1149_v12 }
 0x26d   :  { %2638 = vmatpush3.msra.mxu1 %v3159_v57 }
 0x26e   :  { %2639 = vmatprep.subr.mxu1 %v3149_v54  ;;  %v3201_v13 = vpop.permute.xlu1 %1588 }
 0x26f   :  { %2640 = vmatpush3.msra.mxu1 %v3149_v54  ;;  %2644 = vmatprep.subr.mxu0 %v3201_v13 }
 0x272   :  { %v3205_v14 = vpop.permute.xlu1 %1677 }
 0x273   :  { %2651 = vmatprep.subr.mxu1 %v3205_v14 }
 0x29d   :  { %v2580_v15 = vpop.f32.mrf.mxu1 }
 0x29e   :  { %v656_v17 = vmul.f32 0.17677669, %v2580_v15 }
 0x29f   :  { %v559_v18 = vpop.f32.mrf.mxu1 }
 0x2a0   :  { %v655_v19 = vmul.f32 0.17677669, %v559_v18  ;;  %v3211_v20 = vadd.f32 %v2374_v16, %v656_v17 }
 0x2a2   :  { %v1249_v21 = vsel %vm1245_vm2, %v3211_v20, -inf  ;;  %v3215_v22 = vadd.f32 %v2374_v16, %v655_v19 }
 0x2a3   :  { %1250 = vmax.xlane.f32.xlu1 %v1249_v21  ;;  %v3285_v21 = vpop.permute.xlu1 %1764 }
 0x2a4   :  { %v1246_v23 = vsel %vm1245_vm2, %v3215_v22, -inf }
 0x2a5   :  { %v2587_v24 = vpop.f32.mrf.mxu1  ;;  %1247 = vmax.xlane.f32.xlu0 %v1246_v23 }
 0x2a6   :  { %v658_v26 = vmul.f32 0.17677669, %v2587_v24 }
 0x2a7   :  { %v646_v27 = vpop.f32.mrf.mxu1  ;;  %v3289_v23 = vpop.permute.xlu1 %1762 }
 0x2a8   :  { %v657_v8 = vmul.f32 0.17677669, %v646_v27  ;;  %v3225_v28 = vadd.f32 %v3222_v25, %v658_v26 }
 0x2aa   :  { %v1255_v29 = vsel %vm1245_vm2, %v3225_v28, -inf  ;;  %v3230_v30 = vadd.f32 %v3222_v25, %v657_v8 }
 0x2ab   :  { %1256 = vmax.xlane.f32.xlu1 %v1255_v29 }
 0x2ac   :  { %v1252_v31 = vsel %vm1245_vm2, %v3230_v30, -inf }
 0x2ad   :  { %1253 = vmax.xlane.f32.xlu0 %v1252_v31 }
 0x310   :  { %v2594_v32 = vpop.f32.mrf.mxu1 }
 0x311   :  { %v858_v33 = vmul.f32 0.17677669, %v2594_v32 }
 0x312   :  { %v757_v34 = vpop.f32.mrf.mxu1 }
 0x313   :  { %v3234_v35 = vadd.f32 %v2374_v16, %v858_v33  ;;  %v857_v37 = vmul.f32 0.17677669, %v757_v34  ;;  %v3303_v34 = vpop.permute.xlu0 %1586 }
 0x314   :  { %v2608_v36 = vpop.f32.mrf.mxu0 }
 0x315   :  { %v1048_v38 = vmul.f32 0.17677669, %v2608_v36  ;;  %v1261_v39 = vsel %vm1245_vm2, %v3234_v35, -inf  ;;  %v3242_v44 = vadd.f32 %v2374_v16, %v857_v37 }
 0x316   :  { %v947_v40 = vpop.f32.mrf.mxu0  ;;  %1262 = vmax.xlane.f32.xlu0 %v1261_v39 }
 0x317   :  { %v3238_v41 = vadd.f32 %v2374_v16, %v1048_v38  ;;  %v1047_v42 = vmul.f32 0.17677669, %v947_v40  ;;  %v1258_v47 = vsel %vm1245_vm2, %v3242_v44, -inf }
 0x319   :  { %v1273_v43 = vsel %vm1245_vm2, %v3238_v41, -inf  ;;  %v3246_v48 = vadd.f32 %v2374_v16, %v1047_v42 }
 0x31a   :  { %1274 = vmax.xlane.f32.xlu0 %v1273_v43 }
 0x31b   :  { %v1270_v58 = vsel %vm1245_vm2, %v3246_v48, -inf }
 0x31c   :  { %v2601_v45 = vpop.f32.mrf.mxu1 }
 0x31d   :  { %v860_v46 = vmul.f32 0.17677669, %v2601_v45 }
 0x31e   :  { %v848_v49 = vpop.f32.mrf.mxu1  ;;  %1259 = vmax.xlane.f32.xlu0 %v1258_v47 }
 0x31f   :  { %v859_v50 = vmul.f32 0.17677669, %v848_v49  ;;  %v3249_v51 = vadd.f32 %v3222_v25, %v860_v46 }
 0x321   :  { %v2622_v52 = vpop.f32.mrf.mxu0  ;;  %v1267_v56 = vsel %vm1245_vm2, %v3249_v51, -inf  ;;  %v3256_v59 = vadd.f32 %v3222_v25, %v859_v50 }
 0x322   :  { %v1238_v60 = vmul.f32 0.17677669, %v2622_v52  ;;  %1268 = vmax.xlane.f32.xlu1 %v1267_v56  ;;  %1271 = vmax.xlane.f32.xlu0 %v1270_v58 }
 0x323   :  { %v1137_v61 = vpop.f32.mrf.mxu0  ;;  %v1264_v3 = vsel %vm1245_vm2, %v3256_v59, -inf }
 0x324   :  { %v1237_v62 = vmul.f32 0.17677669, %v1137_v61  ;;  %v2615_v63 = vpop.f32.mrf.mxu1  ;;  %v3258_v0 = vadd.f32 %v2374_v16, %v1238_v60 }
 0x325   :  { %v1050_v2 = vmul.f32 0.17677669, %v2615_v63 }
 0x326   :  { %v1038_v5 = vpop.f32.mrf.mxu1  ;;  %1265 = vmax.xlane.f32.xlu1 %v1264_v3  ;;  %v1285_v1 = vsel %vm1245_vm2, %v3258_v0, -inf  ;;  %v3264_v6 = vadd.f32 %v2374_v16, %v1237_v62 }
 0x327   :  { %v1049_v7 = vmul.f32 0.17677669, %v1038_v5  ;;  %1286 = vmax.xlane.f32.xlu0 %v1285_v1  ;;  %v3267_v9 = vadd.f32 %v3222_v25, %v1050_v2 }
 0x328   :  { %v1282_v12 = vsel %vm1245_vm2, %v3264_v6, -inf }
 0x329   :  { %v1279_v10 = vsel %vm1245_vm2, %v3267_v9, -inf  ;;  %v3272_v11 = vadd.f32 %v3222_v25, %v1049_v7 }
 0x32a   :  { %1280 = vmax.xlane.f32.xlu1 %v1279_v10 }
 0x32b   :  { %1283 = vmax.xlane.f32.xlu0 %v1282_v12  ;;  %v1276_v16 = vsel %vm1245_vm2, %v3272_v11, -inf }
 0x32c   :  { %v2629_v15 = vpop.f32.mrf.mxu1  ;;  %v1251_v24 = vpop.xlane.xlu1 %1250 }
 0x32d   :  { %v1240_v17 = vmul.f32 0.17677669, %v2629_v15  ;;  %v1295_v26 = vsub.f32 %v3211_v20, %v1251_v24  ;;  %v3307_v20 = vpop.permute.xlu0 %1675 }
 0x32e   :  { %1277 = vmax.xlane.f32.xlu1 %v1276_v16  ;;  %v1228_v8 = vpop.f32.mrf.mxu1 }
 0x32f   :  { %v3279_v18 = vadd.f32 %v3222_v25, %v1240_v17  ;;  %v1312_v27 = vmul.f32 1.442695, %v1295_v26  ;;  %v1239_v29 = vmul.f32 0.17677669, %v1228_v8 }
 0x331   :  { %v1291_v19 = vsel %vm1245_vm2, %v3279_v18, -inf  ;;  %2772 = vpow2.f32 %v1312_v27  ;;  %v3295_v31 = vadd.f32 %v3222_v25, %v1239_v29  ;;  %v1248_v36 = vpop.xlane.xlu0 %1247 }
 0x332   :  { %1292 = vmax.xlane.f32.xlu0 %v1291_v19  ;;  %v1294_v25 = vsub.f32 %v3215_v22, %v1248_v36 }
 0x334   :  { %v1257_v37 = vpop.xlane.xlu1 %1256  ;;  %v1310_v38 = vmul.f32 1.442695, %v1294_v25 }
 0x335   :  { %v1297_v39 = vsub.f32 %v3225_v28, %v1257_v37 }
 0x336   :  { %v1254_v40 = vpop.xlane.xlu0 %1253  ;;  %2774 = vpow2.f32 %v1310_v38 }
 0x337   :  { %v1316_v42 = vmul.f32 1.442695, %v1297_v39  ;;  %v1296_v43 = vsub.f32 %v3230_v30, %v1254_v40 }
 0x339   :  { %2776 = vpow2.f32 %v1316_v42  ;;  %v1314_v45 = vmul.f32 1.442695, %v1296_v43 }
 0x33b   :  { %2778 = vpow2.f32 %v1314_v45 }
 0x33e   :  { %v3299_v32 = vpop.eup %2772 }
 0x33f   :  { %1938 = vrot.lane.b32.xlu1 %v3153_v55, %s2993_s8  ;;  %v1288_v55 = vsel %vm1245_vm2, %v3295_v31, -inf  ;;  %v1345_v33 = vsel %vm1245_vm2, %v3299_v32, 0.0 }
 0x343   :  { %v3312_v46 = vpop.eup %2774 }
 0x346   :  { %v3316_v47 = vpop.eup %2776 }
 0x347   :  { %v1351_v22 = vsel %vm1245_vm2, %v3316_v47, 0.0 }
 0x348   :  { %1851 = vrot.lane.b32.xlu0 %v3159_v57, %s2992_s30  ;;  %v3320_v28 = vpop.eup %2778 }
 0x349   :  { %v1348_v30 = vsel %vm1245_vm2, %v3320_v28, 0.0 }
 0x34c   :  { %1849 = vrot.lane.b32.xlu0 %v3149_v54, %s2992_s30 }
 0x363   :  { %1289 = vmax.xlane.f32.xlu1 %v1288_v55 }
 0x36b   :  { %1346 = vadd.xlane.f32.xlu0 %v1345_v33 }
 0x374   :  { %1936 = vrot.lane.b32.xlu1 %v3144_v53, %s2993_s8  ;;  %v1342_v53 = vsel %vm1245_vm2, %v3312_v46, 0.0 }
 0x398   :  { %1343 = vadd.xlane.f32.xlu1 %v1342_v53 }
 0x39c   :  { %1352 = vadd.xlane.f32.xlu1 %v1351_v22 }
 0x39f   :  { %v1263_v49 = vpop.xlane.xlu0 %1262 }
 0x3a0   :  { %v1299_v50 = vsub.f32 %v3234_v35, %v1263_v49  ;;  %1349 = vadd.xlane.f32.xlu1 %v1348_v30 }
 0x3a2   :  { %v1320_v52 = vmul.f32 1.442695, %v1299_v50 }
 0x3a3   :  { %v1275_v56 = vpop.xlane.xlu0 %1274 }
 0x3a4   :  { %2780 = vpow2.f32 %v1320_v52  ;;  %v1303_v58 = vsub.f32 %v3238_v41, %v1275_v56 }
 0x3a6   :  { %v1328_v60 = vmul.f32 1.442695, %v1303_v58 }
 0x3a7   :  { %v1260_v61 = vpop.xlane.xlu0 %1259 }
 0x3a8   :  { %2782 = vpow2.f32 %v1328_v60  ;;  %v1298_v62 = vsub.f32 %v3242_v44, %v1260_v61 }
 0x3aa   :  { %v1318_v63 = vmul.f32 1.442695, %v1298_v62 }
 0x3ab   :  { %v1269_v2 = vpop.xlane.xlu1 %1268  ;;  %v1272_v3 = vpop.xlane.xlu0 %1271 }
 0x3ac   :  { %2784 = vpow2.f32 %v1318_v63  ;;  %v1301_v5 = vsub.f32 %v3249_v51, %v1269_v2  ;;  %v1302_v1 = vsub.f32 %v3246_v48, %v1272_v3 }
 0x3ae   :  { %v1324_v35 = vmul.f32 1.442695, %v1301_v5  ;;  %v1326_v7 = vmul.f32 1.442695, %v1302_v1 }
 0x3af   :  { %v1266_v10 = vpop.xlane.xlu1 %1265 }
 0x3b0   :  { %2786 = vpow2.f32 %v1324_v35  ;;  %v1300_v12 = vsub.f32 %v3256_v59, %v1266_v10  ;;  %v1287_v41 = vpop.xlane.xlu0 %1286 }
 0x3b1   :  { %v3330_v15 = vpop.eup %2780  ;;  %2788 = vpow2.f32 %v1326_v7  ;;  %v1307_v44 = vsub.f32 %v3258_v0, %v1287_v41 }
 0x3b2   :  { %v1322_v17 = vmul.f32 1.442695, %v1300_v12  ;;  %v1357_v16 = vsel %vm1245_vm2, %v3330_v15, 0.0 }
 0x3b3   :  { %v1336_v19 = vmul.f32 1.442695, %v1307_v44  ;;  %v1281_v51 = vpop.xlane.xlu1 %1280  ;;  %1358 = vadd.xlane.f32.xlu0 %v1357_v16 }
 0x3b4   :  { %2790 = vpow2.f32 %v1322_v17  ;;  %v1305_v48 = vsub.f32 %v3267_v9, %v1281_v51  ;;  %v1284_v24 = vpop.xlane.xlu0 %1283 }
 0x3b5   :  { %v3336_v26 = vpop.eup %2782  ;;  %2792 = vpow2.f32 %v1336_v19  ;;  %v1306_v59 = vsub.f32 %v3264_v6, %v1284_v24 }
 0x3b6   :  { %v1332_v27 = vmul.f32 1.442695, %v1305_v48  ;;  %v1369_v0 = vsel %vm1245_vm2, %v3336_v26, 0.0 }
 0x3b7   :  { %v1334_v8 = vmul.f32 1.442695, %v1306_v59  ;;  %v1278_v29 = vpop.xlane.xlu1 %1277  ;;  %1370 = vadd.xlane.f32.xlu0 %v1369_v0 }
 0x3b8   :  { %2794 = vpow2.f32 %v1332_v27  ;;  %v1304_v55 = vsub.f32 %v3272_v11, %v1278_v29 }
 0x3b9   :  { %v3342_v33 = vpop.eup %2784  ;;  %2796 = vpow2.f32 %v1334_v8 }
 0x3ba   :  { %v1330_v9 = vmul.f32 1.442695, %v1304_v55  ;;  %v1354_v36 = vsel %vm1245_vm2, %v3342_v33, 0.0 }
 0x3bb   :  { %v1293_v25 = vpop.xlane.xlu0 %1292  ;;  %1355 = vadd.xlane.f32.xlu0 %v1354_v36  ;;  %v3381_v60 = vpop.permute.xlu1 %1938 }
 0x3bc   :  { %2798 = vpow2.f32 %v1330_v9  ;;  %v1309_v6 = vsub.f32 %v3279_v18, %v1293_v25 }
 0x3bd   :  { %v3347_v37 = vpop.eup %2786 }
 0x3be   :  { %v3349_v38 = vpop.eup %2788  ;;  %v1340_v39 = vmul.f32 1.442695, %v1309_v6  ;;  %v1363_v11 = vsel %vm1245_vm2, %v3347_v37, 0.0 }
 0x3bf   :  { %1364 = vadd.xlane.f32.xlu1 %v1363_v11  ;;  %v1366_v40 = vsel %vm1245_vm2, %v3349_v38, 0.0  ;;  %v3390_v5 = vpop.permute.xlu0 %1851 }
 0x3c0   :  { %2800 = vpow2.f32 %v1340_v39  ;;  %1367 = vadd.xlane.f32.xlu0 %v1366_v40 }
 0x3c1   :  { %v3355_v42 = vpop.eup %2790 }
 0x3c2   :  { %v3357_v43 = vpop.eup %2792  ;;  %v1360_v18 = vsel %vm1245_vm2, %v3355_v42, 0.0 }
 0x3c3   :  { %1361 = vadd.xlane.f32.xlu1 %v1360_v18  ;;  %v1381_v45 = vsel %vm1245_vm2, %v3357_v43, 0.0  ;;  %v3392_v1 = vpop.permute.xlu0 %1849 }
 0x3c4   :  { %1382 = vadd.xlane.f32.xlu0 %v1381_v45 }
 0x3c5   :  { %v3363_v53 = vpop.eup %2794 }
 0x3c6   :  { %v3365_v22 = vpop.eup %2796  ;;  %v1375_v49 = vsel %vm1245_vm2, %v3363_v53, 0.0 }
 0x3c7   :  { %1376 = vadd.xlane.f32.xlu1 %v1375_v49  ;;  %v1378_v30 = vsel %vm1245_vm2, %v3365_v22, 0.0 }
 0x3c8   :  { %1379 = vadd.xlane.f32.xlu0 %v1378_v30 }
 0x3c9   :  { %v3371_v50 = vpop.eup %2798 }
 0x3ca   :  { %v1372_v52 = vsel %vm1245_vm2, %v3371_v50, 0.0 }
 0x3cb   :  { %1373 = vadd.xlane.f32.xlu1 %v1372_v52 }
 0x3cd   :  { %v3375_v56 = vpop.eup %2800 }
 0x3ce   :  { %v1387_v58 = vsel %vm1245_vm2, %v3375_v56, 0.0 }
 0x3cf   :  { %1388 = vadd.xlane.f32.xlu0 %v1387_v58  ;;  %v2185_v58 = vld [vmem:[#allocation10 + $0x68] sm:$0xff] }
 0x3e5   :  { %2025 = vrot.lane.b32.xlu0 %v3159_v57, %s2993_s8 }
 0x3ec   :  { %v1290_v61 = vpop.xlane.xlu1 %1289 }
 0x3ed   :  { %v1308_v62 = vsub.f32 %v3295_v31, %v1290_v61  ;;  %v2183_v61 = vld [vmem:[#allocation10 + $0x58] sm:$0xff] }
 0x3ef   :  { %v1338_v63 = vmul.f32 1.442695, %v1308_v62  ;;  %v2182_v62 = vld [vmem:[#allocation10 + $0x50] sm:$0xff] }
 0x3f0   :  { %v3394_v57 = vpop.permute.xlu1 %1936 }
 0x3f1   :  { %2802 = vpow2.f32 %v1338_v63  ;;  %v2180_v63 = vld [vmem:[#allocation10 + $0x40] sm:$0xff] }
 0x3f4   :  { %v1347_v35 = vpop.xlane.xlu0 %1346 }
 0x3f5   :  { %2804 = vrcp.f32 %v1347_v35 }
 0x3fe   :  { %v3384_v2 = vpop.eup %2802 }
 0x3ff   :  { %v1384_v3 = vsel %vm1245_vm2, %v3384_v2, 0.0 }
 0x400   :  { %1385 = vadd.xlane.f32.xlu1 %v1384_v3  ;;  %v2179_v3 = vld [vmem:[#allocation10 + $0x38] sm:$0xff] }
 0x402   :  { %v2805_v12 = vpop.eup %2804 }
 0x411   :  { %2023 = vrot.lane.b32.xlu1 %v3149_v54, %s2993_s8  ;;  %v1407_v54 = vmul.f32 %v2805_v12, %v3299_v32 }
 0x421   :  { %v1344_v31 = vpop.xlane.xlu1 %1343 }
 0x422   :  { %2806 = vrcp.f32 %v1344_v31  ;;  %v2176_v31 = vld [vmem:[#allocation10 + $0x20] sm:$0xff] }
 0x425   :  { %v1353_v7 = vpop.xlane.xlu1 %1352 }
 0x426   :  { %2808 = vrcp.f32 %v1353_v7  ;;  %v2175_v7 = vld [vmem:[#allocation10 + $0x18] sm:$0xff] }
 0x429   :  { %v1350_v10 = vpop.xlane.xlu1 %1349 }
 0x42a   :  { %2810 = vrcp.f32 %v1350_v10 }
 0x42f   :  { %v2807_v41 = vpop.eup %2806 }
 0x430   :  { %v1406_v44 = vmul.f32 %v2807_v41, %v3312_v46  ;;  %v2174_v41 = vld [vmem:[#allocation10 + $0x10] sm:$0xff] }
 0x432   :  { %2634 = vmatprep.mubr.msk.f32.mxu0 %vm1245_vm2, %v1406_v44 }
 0x433   :  { %2635 = vmatmul.mubr.msk.f32.vlgmr.msra.gmra.mxu0 %vm1245_vm2, %v1407_v54  ;;  %v2809_v17 = vpop.eup %2808 }
 0x434   :  { %2645 = vmatpush3.msra.mxu0 %v3201_v13  ;;  %v1409_v46 = vmul.f32 %v2809_v17, %v3316_v47  ;;  %v2173_v17 = vld [vmem:[#allocation10 + $0x8] sm:$0xff] }
 0x435   :  { %2646 = vmatprep.subr.mxu0 %v3303_v34 }
 0x436   :  { %2647 = vmatpush3.msra.mxu0 %v3303_v34 }
 0x437   :  { %v2811_v16 = vpop.eup %2810  ;;  %2658 = vmatprep.subr.mxu0 %v3285_v21 }
 0x438   :  { %v1408_v19 = vmul.f32 %v2811_v16, %v3320_v28 }
 0x43a   :  { %2641 = vmatprep.mubr.msk.f32.mxu1 %vm1245_vm2, %v1408_v19  ;;  %v2172_v19 = vld [vmem:[#allocation10] sm:$0xff] }
 0x43b   :  { %2642 = vmatmul.mubr.msk.f32.vlgmr.msra.gmra.mxu1 %vm1245_vm2, %v1409_v46 }
 0x43c   :  { %2652 = vmatpush3.msra.mxu1 %v3205_v14  ;;  %v1359_v32 = vpop.xlane.xlu0 %1358 }
 0x43d   :  { %2653 = vmatprep.subr.mxu1 %v3307_v20  ;;  %2812 = vrcp.f32 %v1359_v32 }
 0x43e   :  { %2654 = vmatpush3.msra.mxu1 %v3307_v20 }
 0x43f   :  { %2665 = vmatprep.subr.mxu1 %v3390_v5 }
 0x440   :  { %v1371_v13 = vpop.xlane.xlu0 %1370 }
 0x444   :  { %v1356_v34 = vpop.xlane.xlu0 %1355 }
 0x445   :  { %2814 = vrcp.f32 %v1356_v34 }
 0x446   :  { %2816 = vrcp.f32 %v1371_v13 }
 0x448   :  { %v1365_v28 = vpop.xlane.xlu1 %1364 }
 0x449   :  { %v1368_v47 = vpop.xlane.xlu0 %1367 }
 0x44a   :  { %2818 = vrcp.f32 %v1368_v47  ;;  %v2813_v24 = vpop.eup %2812 }
 0x44b   :  { %2820 = vrcp.f32 %v1365_v28  ;;  %v1411_v8 = vmul.f32 %v2813_v24, %v3330_v15 }
 0x44c   :  { %v1362_v51 = vpop.xlane.xlu1 %1361 }
 0x44d   :  { %2822 = vrcp.f32 %v1362_v51  ;;  %v1383_v48 = vpop.xlane.xlu0 %1382 }
 0x44e   :  { %2824 = vrcp.f32 %v1383_v48 }
 0x450   :  { %v1377_v14 = vpop.xlane.xlu1 %1376 }
 0x451   :  { %v1380_v59 = vpop.xlane.xlu0 %1379 }
 0x452   :  { %v2815_v27 = vpop.eup %2814  ;;  %2826 = vrcp.f32 %v1380_v59 }
 0x453   :  { %v1410_v20 = vmul.f32 %v2815_v27, %v3342_v33  ;;  %2828 = vrcp.f32 %v1377_v14  ;;  %v2817_v29 = vpop.eup %2816 }
 0x454   :  { %v1374_v0 = vpop.xlane.xlu1 %1373  ;;  %v1415_v33 = vmul.f32 %v2817_v29, %v3336_v26 }
 0x455   :  { %2830 = vrcp.f32 %v1374_v0  ;;  %2648 = vmatprep.mubr.msk.f32.mxu0 %vm1245_vm2, %v1410_v20 }
 0x456   :  { %2649 = vmatmul.mubr.msk.f32.vlgmr.msra.gmra.mxu0 %vm1245_vm2, %v1411_v8 }
 0x457   :  { %v2819_v55 = vpop.eup %2818  ;;  %2659 = vmatpush3.msra.mxu0 %v3285_v21 }
 0x458   :  { %2660 = vmatprep.subr.mxu0 %v3289_v23  ;;  %v1414_v9 = vmul.f32 %v2819_v55, %v3349_v38  ;;  %v2821_v36 = vpop.eup %2820  ;;  %v1389_v15 = vpop.xlane.xlu0 %1388 }
 0x459   :  { %2661 = vmatpush3.msra.mxu0 %v3289_v23  ;;  %v1413_v21 = vmul.f32 %v2821_v36, %v3347_v37  ;;  %2832 = vrcp.f32 %v1389_v15 }
 0x45a   :  { %v2823_v25 = vpop.eup %2822  ;;  %2662 = vmatprep.mubr.msk.f32.mxu0 %vm1245_vm2, %v1414_v9  ;;  %2672 = vmatprep.subr.mxu0 %v3381_v60 }
 0x45b   :  { %2663 = vmatmul.mubr.msk.f32.vlgmr.msra.gmra.mxu0 %vm1245_vm2, %v1415_v33  ;;  %v1412_v6 = vmul.f32 %v2823_v25, %v3355_v42  ;;  %v2825_v23 = vpop.eup %2824 }
 0x45c   :  { %2673 = vmatpush3.msra.mxu0 %v3381_v60  ;;  %v2026_v11 = vpop.permute.xlu0 %2025  ;;  %v1419_v37 = vmul.f32 %v2825_v23, %v3357_v43  ;;  %v2184_v60 = vld [vmem:[#allocation10 + $0x60] sm:$0xff] }
 0x45d   :  { %2674 = vmatprep.subr.mxu0 %v3394_v57  ;;  %2655 = vmatprep.mubr.msk.f32.mxu1 %vm1245_vm2, %v1412_v6 }
 0x45e   :  { %2675 = vmatpush3.msra.mxu0 %v3394_v57  ;;  %2656 = vmatmul.mubr.msk.f32.vlgmr.msra.gmra.mxu1 %vm1245_vm2, %v1413_v21 }
 0x45f   :  { %v2827_v26 = vpop.eup %2826  ;;  %2666 = vmatpush3.msra.mxu1 %v3390_v5  ;;  %v2178_v5 = vld [vmem:[#allocation10 + $0x30] sm:$0xff] }
 0x460   :  { %2667 = vmatprep.subr.mxu1 %v3392_v1  ;;  %v1418_v38 = vmul.f32 %v2827_v26, %v3365_v22  ;;  %v2829_v39 = vpop.eup %2828 }
 0x461   :  { %2668 = vmatpush3.msra.mxu1 %v3392_v1  ;;  %v1417_v18 = vmul.f32 %v2829_v39, %v3363_v53  ;;  %v2187_v53 = vld [vmem:[#allocation10 + $0x78] sm:$0xff]  ;;  %v2177_v1 = vld [vmem:[#allocation10 + $0x28] sm:$0xff] }
 0x462   :  { %v2831_v40 = vpop.eup %2830  ;;  %2679 = vmatprep.subr.mxu1 %v2026_v11  ;;  %2676 = vmatprep.mubr.msk.f32.mxu0 %vm1245_vm2, %v1418_v38 }
 0x463   :  { %2677 = vmatmul.mubr.msk.f32.vlgmr.msra.gmra.mxu0 %vm1245_vm2, %v1419_v37  ;;  %v1416_v42 = vmul.f32 %v2831_v40, %v3371_v50  ;;  %v2186_v50 = vld [vmem:[#allocation10 + $0x70] sm:$0xff]  ;;  %2686 = vmatprep.subr.mxu0 %v2187_v53 }
 0x464   :  { %2687 = vmatpush3.msra.mxu0 %v2187_v53 }
 0x465   :  { %2669 = vmatprep.mubr.msk.f32.mxu1 %vm1245_vm2, %v1416_v42  ;;  %2688 = vmatprep.subr.mxu0 %v2186_v50 }
 0x466   :  { %2670 = vmatmul.mubr.msk.f32.vlgmr.msra.gmra.mxu1 %vm1245_vm2, %v1417_v18  ;;  %v2833_v43 = vpop.eup %2832  ;;  %2689 = vmatpush3.msra.mxu0 %v2186_v50 }
 0x467   :  { %2680 = vmatpush3.msra.mxu1 %v2026_v11  ;;  %v1421_v52 = vmul.f32 %v2833_v43, %v3375_v56  ;;  %2690 = vmatprep.subr.mxu0 %v2185_v58  ;;  %v2181_v56 = vld [vmem:[#allocation10 + $0x48] sm:$0xff] }
 0x468   :  { %2691 = vmatpush3.msra.mxu0 %v2185_v58 }
 0x469   :  { %2692 = vmatprep.subr.mxu0 %v2184_v60 }
 0x46a   :  { %2693 = vmatpush3.msra.mxu0 %v2184_v60 }
 0x46b   :  { %2694 = vmatprep.subr.mxu0 %v2183_v61 }
 0x46c   :  { %2695 = vmatpush3.msra.mxu0 %v2183_v61 }
 0x46d   :  { %2696 = vmatprep.subr.mxu0 %v2182_v62 }
 0x46e   :  { %2697 = vmatpush3.msra.mxu0 %v2182_v62  ;;  %v2190_v62 = vsub.s32 4, %v3062_v4 }
 0x46f   :  { %2698 = vmatprep.subr.mxu0 %v2181_v56 }
 0x470   :  { %2699 = vmatpush3.msra.mxu0 %v2181_v56  ;;  %v2844_v56 = vld [vmem:[%s3485_s6] sm:$0x7f]  ;;  %s2994_s6 = smov [#allocation11]  }
 0x471   :  { %2700 = vmatprep.subr.mxu0 %v2180_v63  ;;  %s2351_s14 = sshll.u32 %s2994_s6, 4  ;;  %s2352_s14 = int_to_ptr.vmem [resolvable:$true] %s2351_s14 }
 0x472   :  { %2701 = vmatpush3.msra.mxu0 %v2180_v63  ;;  %v2191_v63 = vrot.slane %v2844_v56, %v2190_v62  ;;  %s2949_s15 = scalar_lea.vmem %s2352_s14, 512  ;;  %p2954_p12 = scmp.lt.s32.totalorder %s2352_s14, %s2352_s14 }
 0x473   :  { %2702 = vmatprep.subr.mxu0 %v2179_v3  ;;  %p2950_p11 = scmp.ne.s32.totalorder %s2352_s14, %s2949_s15  ;;  %p2955_p13 = scmp.lt.s32.totalorder %s2949_s15, %s2949_s15 }
 0x474   :  { %2703 = vmatpush3.msra.mxu0 %v2179_v3 }
 0x475   :  { %2704 = vmatprep.subr.mxu0 %v2178_v5  ;;  %p2956_p0 = por %p2955_p13, %p2954_p12 }
 0x476   :  { %2705 = vmatpush3.msra.mxu0 %v2178_v5 }
 0x477   :  { %2706 = vmatprep.subr.mxu0 %v2177_v1  ;;  %p2957_p1 = pnand %p2956_p0, %p2950_p11 }
 0x478   :  { %2707 = vmatpush3.msra.mxu0 %v2177_v1 }
 0x479   :  { %2708 = vmatprep.subr.mxu0 %v2176_v31 }
 0x47a   :  { %2709 = vmatpush3.msra.mxu0 %v2176_v31  ;;  %v2846_v31 = vld [vmem:[#allocation2] sm:$0xff] }
 0x47b   :  { %2710 = vmatprep.subr.mxu0 %v2175_v7 }
 0x47c   :  { %2711 = vmatpush3.msra.mxu0 %v2175_v7 }
 0x47d   :  { %2712 = vmatprep.subr.mxu0 %v2174_v41 }
 0x47e   :  { %2713 = vmatpush3.msra.mxu0 %v2174_v41 }
 0x47f   :  { %2714 = vmatprep.subr.mxu0 %v2173_v17 }
 0x480   :  { %2715 = vmatpush3.msra.mxu0 %v2173_v17 }
 0x481   :  { %2716 = vmatprep.subr.mxu0 %v2172_v19 }
 0x482   :  { %2717 = vmatpush3.msra.mxu0 %v2172_v19 }
 0x489   :  { %v1386_v45 = vpop.xlane.xlu1 %1385 }
 0x48a   :  { %2834 = vrcp.f32 %v1386_v45 }
 0x48d   :  { %v2024_v22 = vpop.permute.xlu1 %2023 }
 0x48e   :  { %2681 = vmatprep.subr.mxu1 %v2024_v22 }
 0x48f   :  { %2682 = vmatpush3.msra.mxu1 %v2024_v22 }
 0x497   :  { %v2835_v49 = vpop.eup %2834 }
 0x498   :  { %v1420_v30 = vmul.f32 %v2835_v49, %v3384_v2 }
 0x49a   :  { %2683 = vmatprep.mubr.msk.f32.mxu1 %vm1245_vm2, %v1420_v30 }
 0x49b   :  { %2684 = vmatmul.mubr.msk.f32.vlgmr.msra.gmra.mxu1 %vm1245_vm2, %v1421_v52 }
 0x4f3   :  { %v2636_v2 = vpop.f32.mrf.mxu0 }
 0x4f5   :  { %v1494_v57 = vpop.f32.mrf.mxu0 }
 0x4fb   :  { %v3446_v10 = vpop.f32.mrf.mxu1 }
 0x4fd   :  { %v1575_v16 = vpop.f32.mrf.mxu1 }
 0x516   :  { %v2650_v35 = vpop.f32.mrf.mxu0 }
 0x518   :  { %v1664_v12 = vpop.f32.mrf.mxu0 }
 0x519   :  { %v2742_v44 = vpack.i.bf16 %v2650_v35, %v1664_v12 }
 0x51b   :  { %v2664_v54 = vpop.f32.mrf.mxu0  ;;  %2743 = vrot.lane.b32.xlu0 %v2742_v44, %s2993_s8 }
 0x51d   :  { %v1840_v46 = vpop.f32.mrf.mxu0 }
 0x51e   :  { %v2747_v32 = vpack.i.bf16 %v2664_v54, %v1840_v46  ;;  %v2657_v13 = vpop.f32.mrf.mxu1  ;;  %v2847_v54 = vld [vmem:[#allocation2 + $0x10] sm:$0xff] }
 0x520   :  { %2748 = vrot.lane.b32.xlu1 %v2747_v32, %s2992_s30  ;;  %v1753_v34 = vpop.f32.mrf.mxu1 }
 0x521   :  { %v2752_v28 = vpack.i.bf16 %v2657_v13, %v1753_v34 }
 0x523   :  { %v2678_v47 = vpop.f32.mrf.mxu0 }
 0x524   :  { %2753 = vrot.lane.b32.xlu1 %v2752_v28, %s2993_s8 }
 0x525   :  { %v2014_v51 = vpop.f32.mrf.mxu0 }
 0x526   :  { %v2757_v48 = vpack.i.bf16 %v2678_v47, %v2014_v51  ;;  %v2671_v14 = vpop.f32.mrf.mxu1 }
 0x528   :  { %v1927_v24 = vpop.f32.mrf.mxu1  ;;  %2758 = vrot.lane.b32.xlu0 %v2757_v48, %s2991_s29 }
 0x529   :  { %v2762_v59 = vpack.i.bf16 %v2671_v14, %v1927_v24 }
 0x52c   :  { %2763 = vrot.lane.b32.xlu0 %v2762_v59, %s2992_s30 }
 0x55b   :  { %v2685_v27 = vpop.f32.mrf.mxu1 }
 0x55d   :  { %v2101_v20 = vpop.f32.mrf.mxu1 }
 0x55e   :  { %v2767_v0 = vpack.i.bf16 %v2685_v27, %v2101_v20 }
 0x560   :  { %2768 = vrot.lane.b32.xlu1 %v2767_v0, %s2991_s29 }
 0x58d   :  { %v2744_v8 = vpop.permute.xlu0 %2743 }
 0x58e   :  { %v2746_v55 = vunpack.i.h.bf16 %v2744_v8  ;;  %v2745_v9 = vunpack.i.l.bf16 %v2744_v8 }
 0x590   :  { %v2159_v15 = vsel %vm127_vm1, %v2636_v2, %v2746_v55  ;;  %v2158_v23 = vsel %vm127_vm1, %v1494_v57, %v2745_v9  ;;  %v2845_v57 = vld [vmem:[#allocation2 + $0x8] sm:$0xff] }
 0x592   :  { %v2749_v29 = vpop.permute.xlu1 %2748 }
 0x593   :  { %v2751_v36 = vunpack.i.h.bf16 %v2749_v29  ;;  %v2750_v33 = vunpack.i.l.bf16 %v2749_v29 }
 0x595   :  { %v2163_v26 = vsel %vm2162_vm3, %v2158_v23, %v2750_v33  ;;  %v2164_v38 = vsel %vm2162_vm3, %v2159_v15, %v2751_v36 }
 0x596   :  { %v2754_v37 = vpop.permute.xlu1 %2753 }
 0x597   :  { %v2756_v42 = vunpack.i.h.bf16 %v2754_v37  ;;  %v2755_v18 = vunpack.i.l.bf16 %v2754_v37 }
 0x599   :  { %v2160_v52 = vsel %vm127_vm1, %v1575_v16, %v2755_v18  ;;  %v2161_v53 = vsel %vm127_vm1, %v3446_v10, %v2756_v42  ;;  %v2848_v16 = vld [vmem:[#allocation2 + $0x18] sm:$0xff] }
 0x59a   :  { %v2759_v25 = vpop.permute.xlu0 %2758 }
 0x59b   :  { %v2761_v6 = vunpack.i.h.bf16 %v2759_v25  ;;  %v2760_v21 = vunpack.i.l.bf16 %v2759_v25 }
 0x59d   :  { %v2168_v39 = vsel %vm2167_vm4, %v2163_v26, %v2760_v21  ;;  %v2169_v11 = vsel %vm2167_vm4, %v2164_v38, %v2761_v6  ;;  %v2328_v6 = vsub.s32 5, %v3062_v4  ;;  %v2336_v21 = vsub.s32 6, %v3062_v4 }
 0x59e   :  { %2718 = vmatprep.mubr.f32.mxu0 %v2168_v39  ;;  %v2764_v40 = vpop.permute.xlu0 %2763 }
 0x59f   :  { %2719 = vmatmul.mubr.f32.vlgmr.msra.gmra.mxu0 %v2169_v11  ;;  %v2766_v45 = vunpack.i.h.bf16 %v2764_v40  ;;  %v2765_v22 = vunpack.i.l.bf16 %v2764_v40  ;;  %v2329_v23 = vrot.slane %v2844_v56, %v2328_v6  ;;  %v2337_v39 = vrot.slane %v2844_v56, %v2336_v21 }
 0x5a1   :  { %v2165_v50 = vsel %vm2162_vm3, %v2160_v52, %v2765_v22  ;;  %v2166_v58 = vsel %vm2162_vm3, %v2161_v53, %v2766_v45 }
 0x5d2   :  { %v2769_v43 = vpop.permute.xlu1 %2768 }
 0x5d3   :  { %v2771_v49 = vunpack.i.h.bf16 %v2769_v43  ;;  %v2770_v30 = vunpack.i.l.bf16 %v2769_v43 }
 0x5d5   :  { %v2170_v60 = vsel %vm2167_vm4, %v2165_v50, %v2770_v30  ;;  %v2171_v61 = vsel %vm2167_vm4, %v2166_v58, %v2771_v49 }
 0x5d6   :  { %2721 = vmatprep.mubr.f32.mxu0 %v2170_v60 }
 0x5d7   :  { %2722 = vmatmul.mubr.f32.gmra.mxu0 %v2171_v61 }
 0x65f   :  { %v2720_v2 = vpop.f32.mrf.mxu0 }
 0x660   :  { %v2264_v3 = vadd.f32 %v2720_v2, %v2191_v63 }
 0x661   :  { %v2258_v5 = vpop.f32.mrf.mxu0 }
 0x662   :  { %v2259_v1 = vadd.f32 %v2258_v5, %v2191_v63  ;;  %v2278_v35 = vadd.f32 %v2845_v57, %v2264_v3 }
 0x664   :  { %2283 = vadd.xlane.f32.xlu1 %v2278_v35  ;;  %v2277_v7 = vadd.f32 %v2846_v31, %v2259_v1 }
 0x666   :  { %2281 = vadd.xlane.f32.xlu0 %v2277_v7 }
 0x697   :  { %v2723_v10 = vpop.f32.mrf.mxu0 }
 0x698   :  { %v2274_v44 = vadd.f32 %v2723_v10, %v2191_v63 }
 0x699   :  { %v2268_v12 = vpop.f32.mrf.mxu0 }
 0x69a   :  { %v2269_v41 = vadd.f32 %v2268_v12, %v2191_v63  ;;  %v2280_v19 = vadd.f32 %v2848_v16, %v2274_v44 }
 0x69c   :  { %v2279_v17 = vadd.f32 %v2847_v54, %v2269_v41 }
 0x69e   :  { %2285 = vadd.xlane.f32.xlu0 %v2279_v17 }
 0x6a2   :  { %2287 = vadd.xlane.f32.xlu0 %v2280_v19 }
 0x6ed   :  { %v2284_v46 = vpop.xlane.xlu1 %2283 }
 0x6ee   :  { %v2291_v32 = vmul.f32 0.0078125, %v2284_v46 }
 0x6ef   :  { %v2282_v13 = vpop.xlane.xlu0 %2281 }
 0x6f0   :  { %v2295_v34 = vsub.f32 %v2278_v35, %v2291_v32  ;;  %v2290_v28 = vmul.f32 0.0078125, %v2282_v13 }
 0x6f2   :  { %v2294_v47 = vsub.f32 %v2277_v7, %v2290_v28  ;;  %v2299_v51 = vmul.f32 %v2295_v34, %v2295_v34 }
 0x6f4   :  { %2304 = vadd.xlane.f32.xlu0 %v2299_v51  ;;  %v2298_v48 = vmul.f32 %v2294_v47, %v2294_v47 }
 0x6f6   :  { %2302 = vadd.xlane.f32.xlu1 %v2298_v48 }
 0x727   :  { %v2286_v14 = vpop.xlane.xlu0 %2285 }
 0x728   :  { %v2292_v24 = vmul.f32 0.0078125, %v2286_v14 }
 0x72a   :  { %v2296_v59 = vsub.f32 %v2279_v17, %v2292_v24 }
 0x72b   :  { %v2288_v27 = vpop.xlane.xlu0 %2287 }
 0x72c   :  { %v2293_v20 = vmul.f32 0.0078125, %v2288_v27  ;;  %v2300_v0 = vmul.f32 %v2296_v59, %v2296_v59 }
 0x72e   :  { %v2297_v8 = vsub.f32 %v2280_v19, %v2293_v20  ;;  %2306 = vadd.xlane.f32.xlu1 %v2300_v0 }
 0x730   :  { %v2301_v29 = vmul.f32 %v2297_v8, %v2297_v8 }
 0x732   :  { %2308 = vadd.xlane.f32.xlu0 %v2301_v29 }
 0x77d   :  { %v2305_v55 = vpop.xlane.xlu0 %2304 }
 0x77e   :  { %v2311_v9 = vmul.f32 0.0078125, %v2305_v55 }
 0x77f   :  { %v2303_v36 = vpop.xlane.xlu1 %2302 }
 0x780   :  { %v2315_v33 = vadd.f32 1e-05, %v2311_v9  ;;  %v2310_v25 = vmul.f32 0.0078125, %v2303_v36 }
 0x782   :  { %2836 = vrsqrt.f32 %v2315_v33  ;;  %v2314_v15 = vadd.f32 1e-05, %v2310_v25 }
 0x784   :  { %2838 = vrsqrt.f32 %v2314_v15 }
 0x78f   :  { %v2837_v26 = vpop.eup %2836 }
 0x790   :  { %v2323_v38 = vmul.f32 %v2837_v26, %v2295_v34 }
 0x791   :  { %v2839_v11 = vpop.eup %2838 }
 0x792   :  { %v2322_v37 = vmul.f32 %v2839_v11, %v2294_v47  ;;  %v2331_v40 = vmul.f32 %v2329_v23, %v2323_v38 }
 0x794   :  { %v2330_v42 = vmul.f32 %v2329_v23, %v2322_v37  ;;  %v2339_v18 = vadd.f32 %v2337_v39, %v2331_v40 }
 0x796   :  { %v2338_v45 = vadd.f32 %v2337_v39, %v2330_v42  ;;  %2343 = vst [vmem:[#allocation11 + $0x8] sm:$0xff] %v2339_v18 }
 0x798   :  { %2342 = vst [vmem:[#allocation11] sm:$0xff] %v2338_v45 }
 0x7b7   :  { %v2307_v22 = vpop.xlane.xlu1 %2306 }
 0x7b8   :  { %v2312_v43 = vmul.f32 0.0078125, %v2307_v22 }
 0x7ba   :  { %v2316_v49 = vadd.f32 1e-05, %v2312_v43 }
 0x7bb   :  { %v2309_v30 = vpop.xlane.xlu0 %2308 }
 0x7bc   :  { %2840 = vrsqrt.f32 %v2316_v49  ;;  %v2313_v52 = vmul.f32 0.0078125, %v2309_v30 }
 0x7be   :  { %v2317_v53 = vadd.f32 1e-05, %v2313_v52 }
 0x7c0   :  { %2842 = vrsqrt.f32 %v2317_v53 }
 0x7c9   :  { %v2841_v4 = vpop.eup %2840 }
 0x7ca   :  { %v2324_v50 = vmul.f32 %v2841_v4, %v2296_v59 }
 0x7cc   :  { %v2332_v58 = vmul.f32 %v2329_v23, %v2324_v50 }
 0x7cd   :  { %v2843_v60 = vpop.eup %2842 }
 0x7ce   :  { %v2325_v61 = vmul.f32 %v2843_v60, %v2297_v8  ;;  %v2340_v62 = vadd.f32 %v2337_v39, %v2332_v58 }
 0x7d0   :  { %v2333_v56 = vmul.f32 %v2329_v23, %v2325_v61  ;;  %2344 = vst [vmem:[#allocation11 + $0x10] sm:$0xff] %v2340_v62 }
 0x7d2   :  { %v2341_v63 = vadd.f32 %v2337_v39, %v2333_v56 }
 0x7d4   :  { %2345 = vst [vmem:[#allocation11 + $0x18] sm:$0xff] %v2341_v63 }
 0x7d5   :  { %2960 = shalt.err (!%p2957_p1)
}
 0x7d6   :  { %2357 = dma.vmem_to_hbm [thread:$0]  %s2352_s14, 512, %s3486_s7, [#allocation4], %s2984_s17, %s2984_s17, %s2985_s18  }
 0x7d7   :  { %2975 = dma.done.wait [#allocation4], 512  }
 0x7d8   :  { %2976 = vsyncadd [#allocation4], 4294966784 }
 0x7d9   :  { %2361 = vsyncpa [#allocation3], 1 }
 0x7da   :  { %2362 = vsyncpa [#allocation6], 1 }
 0x7db   :  { %2363 = vsyncpa [#allocation9], 1 }
 0x7dc   :  { %2364 = vsyncpa [#allocation4], 1 }

</bundles_post_ra>
